<compile_context>
chip_gen: v7x
topology: tpu7x:2x2x1
jax: 0.10.0
libtpu: 0.0.40
codegen_flags: <defaults>
</compile_context>

<pallas_src>
import functools

import jax
import jax.numpy as jnp
import numpy as np
from jax.experimental import pallas as pl
from jax.experimental.pallas import tpu as pltpu


def _round_up(x, m):
    return (x + m - 1) // m * m


def _pick_compute_dtype():
    """bf16 taps/weights on v6e/v7x (MXU-native); f32 elsewhere (v5e etc.)."""
    try:
        kind = jax.devices()[0].device_kind.lower()
    except Exception:
        return jnp.float32
    if any(tag in kind for tag in ("v6", "v7", "tpu6", "tpu7")):
        return jnp.bfloat16
    return jnp.float32


def _make_halo_masks(H, W):
    """(8, H*W) 0/1 masks, one per non-center 3x3 tap, in (dy, dx) emission order."""
    pix = np.arange(H * W)
    h, w = pix // W, pix % W
    rows = []
    for dy in (-1, 0, 1):
        for dx in (-1, 0, 1):
            if dy == 0 and dx == 0:
                continue
            valid = (h + dy >= 0) & (h + dy < H) & (w + dx >= 0) & (w + dx < W)
            rows.append(valid.astype(np.float32))
    return np.stack(rows, axis=0)


def _pack_conv_weight(w_hwio, b, cin_pad, cout_pad, dtype):
    """(3,3,Cin,Cout)+bias -> (cout_pad, 9*cin_pad + 8); K ordered (tap, cin).

    The trailing 8 columns carry the bias in column 0; they pair with an 8-row
    ones block appended to the im2col patches inside the kernel."""
    kh, kw, cin, cout = w_hwio.shape
    w = jnp.pad(w_hwio, ((0, 0), (0, 0), (0, cin_pad - cin), (0, cout_pad - cout)))
    w = w.reshape(kh * kw * cin_pad, cout_pad).T              # (cout_pad, 9*cin_pad)
    bias_blk = jnp.zeros((cout_pad, 8), w.dtype).at[:, 0].set(
        jnp.pad(b, (0, cout_pad - cout)))
    return jnp.concatenate([w, bias_blk], axis=1).astype(dtype)


def _fused_modulate_kernel(mask_ref, x_ref, w1_ref, w2_ref, gamma_ref, beta_ref,
                           *, img_w, feat_p):
    """Whole batch in one step, everything in (channels, N*H*W) layout.

    mask_ref: (8, NHW)            0/1 halo masks (compute dtype)
    x_ref:    (cin_p, NHW)        input, channels padded to a multiple of 8
    w1_ref:   (feat_p, 9*cin_p+8) shared conv (bias folded into last K block)
    w2_ref:   (2*feat_p, 9*feat_p+8) gamma rows stacked on beta rows
    gamma_ref/beta_ref: (feat_p, NHW)
    """
    nhw = x_ref.shape[-1]
    cdt = x_ref.dtype
    prec = jax.lax.Precision.HIGHEST if cdt == jnp.float32 else None

    masks = mask_ref[...]                        # (8, nhw) — shared by both convs
    bias_rows = jnp.ones((8, nhw), dtype=cdt)    # pairs with the bias weight cols

    def conv3x3(x, w_mat):
        # x: (C, nhw); w_mat: (Cout, 9*C + 8) -> (Cout, nhw) f32 (MXU accumulate).
        taps, t = [], 0
        for dy in (-1, 0, 1):
            for dx in (-1, 0, 1):
                if dy == 0 and dx == 0:
                    taps.append(x)
                    continue
                d = dy * img_w + dx
                # shifted[p] = x[p + d]; out-of-image / cross-image positions are
                # zeroed by the precomputed halo mask (== 'same' zero padding).
                shifted = pltpu.roll(x, (-d) % nhw, axis=1)
                taps.append(shifted * masks[t:t + 1, :])
                t += 1
        taps.append(bias_rows)
        patches = jnp.concatenate(taps, axis=0)              # (9*C + 8, nhw) im2col
        return jnp.dot(w_mat, patches, precision=prec,
                       preferred_element_type=jnp.float32)

    actv = jnp.maximum(conv3x3(x_ref[...], w1_ref[...]), 0.0)   # f32, stays on-chip
    gb = conv3x3(actv.astype(cdt), w2_ref[...])                 # (2*feat_p, nhw)
    gamma_ref[...] = gb[:feat_p].astype(gamma_ref.dtype)
    beta_ref[...] = gb[feat_p:].astype(beta_ref.dtype)


def spatial_modulate_factor(da_map_nchw, params, compute_dtype=None):
    """Matches the PyTorch module's forward: returns (gamma, beta), both NCHW."""
    N, cin, H, W = da_map_nchw.shape
    feat_nc = params["w_gamma"].shape[-1]
    if compute_dtype is None:
        compute_dtype = _pick_compute_dtype()

    HW = H * W
    NHW = N * HW
    cin_p = _round_up(cin, 8)      # sublane-aligned taps / concat / matmul K blocks
    feat_p = _round_up(feat_nc, 8)

    # NCHW -> (cin_p, N*H*W): channels on sublanes, batch*pixels on the lane axis.
    x = jnp.transpose(da_map_nchw, (1, 0, 2, 3)).reshape(cin, NHW)
    x = jnp.pad(x, ((0, cin_p - cin), (0, 0))).astype(compute_dtype)

    # Halo masks built once host-side, tiled per image along the lane axis.
    mask = jnp.asarray(np.tile(_make_halo_masks(H, W), (1, N)), dtype=compute_dtype)

    w1 = _pack_conv_weight(params["w_shared"], params["b_shared"],
                           cin_p, feat_p, compute_dtype)
    # gamma + beta convs fused into a single Cout = 2*feat_p matmul.
    w2 = jnp.concatenate(
        [_pack_conv_weight(params["w_gamma"], params["b_gamma"],
                           feat_p, feat_p, compute_dtype),
         _pack_conv_weight(params["w_beta"], params["b_beta"],
                           feat_p, feat_p, compute_dtype)], axis=0)

    # TODO(synk): for large H*W (e.g. >=128x128 spatial) tile the lane axis with a
    # grid so the 9x im2col blow-up stays inside v7x's 64 MiB VMEM; trivial here.

    vmem = pl.BlockSpec(memory_space=pltpu.MemorySpace.VMEM)
    kernel = functools.partial(_fused_modulate_kernel, img_w=W, feat_p=feat_p)
    out_dtype = da_map_nchw.dtype
    gamma, beta = pl.pallas_call(
        kernel,
        out_shape=(jax.ShapeDtypeStruct((feat_p, NHW), out_dtype),
                   jax.ShapeDtypeStruct((feat_p, NHW), out_dtype)),
        in_specs=[vmem, vmem, vmem, vmem],
        out_specs=(vmem, vmem),
    )(mask, x, w1, w2)

    gamma = jnp.transpose(gamma.reshape(feat_p, N, H, W), (1, 0, 2, 3))[:, :feat_nc]
    beta = jnp.transpose(beta.reshape(feat_p, N, H, W), (1, 0, 2, 3))[:, :feat_nc]
    return gamma, beta


def init_params(key, feat_nc, da_map_nc):
    """Deterministic synthetic parameters (HWIO weight layout)."""
    ks = jax.random.split(key, 6)

    def conv_init(kw, kb, cin, cout):
        w = jax.random.normal(kw, (3, 3, cin, cout), jnp.float32) / np.sqrt(9.0 * cin)
        b = jax.random.normal(kb, (cout,), jnp.float32) * 0.1
        return w, b

    w_s, b_s = conv_init(ks[0], ks[1], da_map_nc, feat_nc)
    w_g, b_g = conv_init(ks[2], ks[3], feat_nc, feat_nc)
    w_b, b_b = conv_init(ks[4], ks[5], feat_nc, feat_nc)
    return dict(w_shared=w_s, b_shared=b_s,
                w_gamma=w_g, b_gamma=b_g,
                w_beta=w_b, b_beta=b_b)


# ---- pure-JAX reference (for correctness check) ----
def _ref_conv(x_nhwc, w_hwio, b):
    y = jax.lax.conv_general_dilated(
        x_nhwc, w_hwio, window_strides=(1, 1), padding="SAME",
        dimension_numbers=("NHWC", "HWIO", "NHWC"),
        precision=jax.lax.Precision.HIGHEST)
    return y + b[None, None, None, :]


def reference(da_map_nchw, params):
    x = jnp.transpose(da_map_nchw, (0, 2, 3, 1))
    actv = jnp.maximum(_ref_conv(x, params["w_shared"], params["b_shared"]), 0.0)
    gamma = _ref_conv(actv, params["w_gamma"], params["b_gamma"])
    beta = _ref_conv(actv, params["w_beta"], params["b_beta"])
    return (jnp.transpose(gamma, (0, 3, 1, 2)),
            jnp.transpose(beta, (0, 3, 1, 2)))


if __name__ == "__main__":
    key = jax.random.PRNGKey(0)
    k_in, k_par = jax.random.split(key)

    N, da_map_nc, feat_nc, H, W = 2, 4, 8, 16, 16
    da_map = jax.random.normal(k_in, (N, da_map_nc, H, W), jnp.float32)
    params = init_params(k_par, feat_nc, da_map_nc)

    cdt = _pick_compute_dtype()
    gamma, beta = spatial_modulate_factor(da_map, params, compute_dtype=cdt)
    jax.block_until_ready((gamma, beta))

    assert gamma.shape == (N, feat_nc, H, W)
    assert beta.shape == (N, feat_nc, H, W)

    g_ref, bt_ref = reference(da_map, params)
    err = max(float(jnp.max(jnp.abs(gamma - g_ref))),
              float(jnp.max(jnp.abs(beta - bt_ref))))
    # f32 path uses Precision.HIGHEST (multi-pass MXU) -> tight check; the bf16
    # tap path on v6e/v7x carries ~2^-9 input/actv quantization noise, hence the
    # looser bound (still far below any packing/layout-mistake magnitude ~0.3+).
    tol = 1e-4 if cdt == jnp.float32 else 8e-2
    assert err < tol, f"max abs error {err} (tol {tol}, compute dtype {cdt})"

    print("KERNEL_OK")
</pallas_src>

<mosaic_0001>
module attributes {stable_mosaic.version = 11 : i64} {
  func.func @_fused_modulate_kernel(%arg0: memref<8x512xf32, #tpu.memory_space<vmem>>, %arg1: memref<8x512xf32, #tpu.memory_space<vmem>>, %arg2: memref<8x80xf32, #tpu.memory_space<vmem>>, %arg3: memref<16x80xf32, #tpu.memory_space<vmem>>, %arg4: memref<8x512xf32, #tpu.memory_space<vmem>>, %arg5: memref<8x512xf32, #tpu.memory_space<vmem>>) attributes {dimension_semantics = [], scalar_prefetch = 0 : i64, scratch_operands = 0 : i64, tpu.core_type = #tpu.core_type<tc>} {
    %c0 = arith.constant 0 : index
    %c0_0 = arith.constant 0 : index
    %0 = vector.load %arg0[%c0, %c0_0] : memref<8x512xf32, #tpu.memory_space<vmem>>, vector<8x512xf32>
    %cst = arith.constant 1.000000e+00 : f32
    %1 = vector.broadcast %cst : f32 to vector<8x512xf32>
    %c0_1 = arith.constant 0 : index
    %c0_2 = arith.constant 0 : index
    %2 = vector.load %arg1[%c0_1, %c0_2] : memref<8x512xf32, #tpu.memory_space<vmem>>, vector<8x512xf32>
    %c0_3 = arith.constant 0 : index
    %c0_4 = arith.constant 0 : index
    %3 = vector.load %arg2[%c0_3, %c0_4] : memref<8x80xf32, #tpu.memory_space<vmem>>, vector<8x80xf32>
    %c17_i32 = arith.constant 17 : i32
    %4 = tpu.dynamic_rotate %2 by %c17_i32 dim 1 : vector<8x512xf32>, i32 -> vector<8x512xf32>
    %5 = vector.extract_strided_slice %0 {offsets = [0, 0], sizes = [1, 512], strides = [1, 1]} : vector<8x512xf32> to vector<1x512xf32>
    %6 = vector.broadcast %5 : vector<1x512xf32> to vector<8x512xf32>
    %7 = arith.mulf %4, %6 : vector<8x512xf32>
    %c16_i32 = arith.constant 16 : i32
    %8 = tpu.dynamic_rotate %2 by %c16_i32 dim 1 : vector<8x512xf32>, i32 -> vector<8x512xf32>
    %9 = vector.extract_strided_slice %0 {offsets = [1, 0], sizes = [1, 512], strides = [1, 1]} : vector<8x512xf32> to vector<1x512xf32>
    %10 = vector.broadcast %9 : vector<1x512xf32> to vector<8x512xf32>
    %11 = arith.mulf %8, %10 : vector<8x512xf32>
    %c15_i32 = arith.constant 15 : i32
    %12 = tpu.dynamic_rotate %2 by %c15_i32 dim 1 : vector<8x512xf32>, i32 -> vector<8x512xf32>
    %13 = vector.extract_strided_slice %0 {offsets = [2, 0], sizes = [1, 512], strides = [1, 1]} : vector<8x512xf32> to vector<1x512xf32>
    %14 = vector.broadcast %13 : vector<1x512xf32> to vector<8x512xf32>
    %15 = arith.mulf %12, %14 : vector<8x512xf32>
    %c1_i32 = arith.constant 1 : i32
    %16 = tpu.dynamic_rotate %2 by %c1_i32 dim 1 : vector<8x512xf32>, i32 -> vector<8x512xf32>
    %17 = vector.extract_strided_slice %0 {offsets = [3, 0], sizes = [1, 512], strides = [1, 1]} : vector<8x512xf32> to vector<1x512xf32>
    %18 = vector.broadcast %17 : vector<1x512xf32> to vector<8x512xf32>
    %19 = arith.mulf %16, %18 : vector<8x512xf32>
    %c511_i32 = arith.constant 511 : i32
    %20 = tpu.dynamic_rotate %2 by %c511_i32 dim 1 : vector<8x512xf32>, i32 -> vector<8x512xf32>
    %21 = vector.extract_strided_slice %0 {offsets = [4, 0], sizes = [1, 512], strides = [1, 1]} : vector<8x512xf32> to vector<1x512xf32>
    %22 = vector.broadcast %21 : vector<1x512xf32> to vector<8x512xf32>
    %23 = arith.mulf %20, %22 : vector<8x512xf32>
    %c497_i32 = arith.constant 497 : i32
    %24 = tpu.dynamic_rotate %2 by %c497_i32 dim 1 : vector<8x512xf32>, i32 -> vector<8x512xf32>
    %25 = vector.extract_strided_slice %0 {offsets = [5, 0], sizes = [1, 512], strides = [1, 1]} : vector<8x512xf32> to vector<1x512xf32>
    %26 = vector.broadcast %25 : vector<1x512xf32> to vector<8x512xf32>
    %27 = arith.mulf %24, %26 : vector<8x512xf32>
    %c496_i32 = arith.constant 496 : i32
    %28 = tpu.dynamic_rotate %2 by %c496_i32 dim 1 : vector<8x512xf32>, i32 -> vector<8x512xf32>
    %29 = vector.extract_strided_slice %0 {offsets = [6, 0], sizes = [1, 512], strides = [1, 1]} : vector<8x512xf32> to vector<1x512xf32>
    %30 = vector.broadcast %29 : vector<1x512xf32> to vector<8x512xf32>
    %31 = arith.mulf %28, %30 : vector<8x512xf32>
    %c495_i32 = arith.constant 495 : i32
    %32 = tpu.dynamic_rotate %2 by %c495_i32 dim 1 : vector<8x512xf32>, i32 -> vector<8x512xf32>
    %33 = vector.extract_strided_slice %0 {offsets = [7, 0], sizes = [1, 512], strides = [1, 1]} : vector<8x512xf32> to vector<1x512xf32>
    %34 = vector.broadcast %33 : vector<1x512xf32> to vector<8x512xf32>
    %35 = arith.mulf %32, %34 : vector<8x512xf32>
    %36 = tpu.concatenate %7, %11, %15, %19, %2, %23, %27, %31, %35, %1 in 0 : vector<8x512xf32>, vector<8x512xf32>, vector<8x512xf32>, vector<8x512xf32>, vector<8x512xf32>, vector<8x512xf32>, vector<8x512xf32>, vector<8x512xf32>, vector<8x512xf32>, vector<8x512xf32> -> vector<80x512xf32>
    %cst_5 = arith.constant dense<0.000000e+00> : vector<8x512xf32>
    %37 = tpu.matmul %3, %36, %cst_5 {dimension_numbers = #tpu.dot_dimension_numbers<[1], [0], [0], [1], [0, 0, 1, 1], [], []>, precision = #tpu.contract_precision<fp32>} : vector<8x80xf32>, vector<80x512xf32>, vector<8x512xf32> -> vector<8x512xf32>
    %cst_6 = arith.constant 0.000000e+00 : f32
    %38 = vector.broadcast %cst_6 : f32 to vector<8x512xf32>
    %39 = arith.maximumf %37, %38 : vector<8x512xf32>
    %c0_7 = arith.constant 0 : index
    %c0_8 = arith.constant 0 : index
    %40 = vector.load %arg3[%c0_7, %c0_8] : memref<16x80xf32, #tpu.memory_space<vmem>>, vector<16x80xf32>
    %c17_i32_9 = arith.constant 17 : i32
    %41 = tpu.dynamic_rotate %39 by %c17_i32_9 dim 1 : vector<8x512xf32>, i32 -> vector<8x512xf32>
    %42 = vector.extract_strided_slice %0 {offsets = [0, 0], sizes = [1, 512], strides = [1, 1]} : vector<8x512xf32> to vector<1x512xf32>
    %43 = vector.broadcast %42 : vector<1x512xf32> to vector<8x512xf32>
    %44 = arith.mulf %41, %43 : vector<8x512xf32>
    %c16_i32_10 = arith.constant 16 : i32
    %45 = tpu.dynamic_rotate %39 by %c16_i32_10 dim 1 : vector<8x512xf32>, i32 -> vector<8x512xf32>
    %46 = vector.extract_strided_slice %0 {offsets = [1, 0], sizes = [1, 512], strides = [1, 1]} : vector<8x512xf32> to vector<1x512xf32>
    %47 = vector.broadcast %46 : vector<1x512xf32> to vector<8x512xf32>
    %48 = arith.mulf %45, %47 : vector<8x512xf32>
    %c15_i32_11 = arith.constant 15 : i32
    %49 = tpu.dynamic_rotate %39 by %c15_i32_11 dim 1 : vector<8x512xf32>, i32 -> vector<8x512xf32>
    %50 = vector.extract_strided_slice %0 {offsets = [2, 0], sizes = [1, 512], strides = [1, 1]} : vector<8x512xf32> to vector<1x512xf32>
    %51 = vector.broadcast %50 : vector<1x512xf32> to vector<8x512xf32>
    %52 = arith.mulf %49, %51 : vector<8x512xf32>
    %c1_i32_12 = arith.constant 1 : i32
    %53 = tpu.dynamic_rotate %39 by %c1_i32_12 dim 1 : vector<8x512xf32>, i32 -> vector<8x512xf32>
    %54 = vector.extract_strided_slice %0 {offsets = [3, 0], sizes = [1, 512], strides = [1, 1]} : vector<8x512xf32> to vector<1x512xf32>
    %55 = vector.broadcast %54 : vector<1x512xf32> to vector<8x512xf32>
    %56 = arith.mulf %53, %55 : vector<8x512xf32>
    %c511_i32_13 = arith.constant 511 : i32
    %57 = tpu.dynamic_rotate %39 by %c511_i32_13 dim 1 : vector<8x512xf32>, i32 -> vector<8x512xf32>
    %58 = vector.extract_strided_slice %0 {offsets = [4, 0], sizes = [1, 512], strides = [1, 1]} : vector<8x512xf32> to vector<1x512xf32>
    %59 = vector.broadcast %58 : vector<1x512xf32> to vector<8x512xf32>
    %60 = arith.mulf %57, %59 : vector<8x512xf32>
    %c497_i32_14 = arith.constant 497 : i32
    %61 = tpu.dynamic_rotate %39 by %c497_i32_14 dim 1 : vector<8x512xf32>, i32 -> vector<8x512xf32>
    %62 = vector.extract_strided_slice %0 {offsets = [5, 0], sizes = [1, 512], strides = [1, 1]} : vector<8x512xf32> to vector<1x512xf32>
    %63 = vector.broadcast %62 : vector<1x512xf32> to vector<8x512xf32>
    %64 = arith.mulf %61, %63 : vector<8x512xf32>
    %c496_i32_15 = arith.constant 496 : i32
    %65 = tpu.dynamic_rotate %39 by %c496_i32_15 dim 1 : vector<8x512xf32>, i32 -> vector<8x512xf32>
    %66 = vector.extract_strided_slice %0 {offsets = [6, 0], sizes = [1, 512], strides = [1, 1]} : vector<8x512xf32> to vector<1x512xf32>
    %67 = vector.broadcast %66 : vector<1x512xf32> to vector<8x512xf32>
    %68 = arith.mulf %65, %67 : vector<8x512xf32>
    %c495_i32_16 = arith.constant 495 : i32
    %69 = tpu.dynamic_rotate %39 by %c495_i32_16 dim 1 : vector<8x512xf32>, i32 -> vector<8x512xf32>
    %70 = vector.extract_strided_slice %0 {offsets = [7, 0], sizes = [1, 512], strides = [1, 1]} : vector<8x512xf32> to vector<1x512xf32>
    %71 = vector.broadcast %70 : vector<1x512xf32> to vector<8x512xf32>
    %72 = arith.mulf %69, %71 : vector<8x512xf32>
    %73 = tpu.concatenate %44, %48, %52, %56, %39, %60, %64, %68, %72, %1 in 0 : vector<8x512xf32>, vector<8x512xf32>, vector<8x512xf32>, vector<8x512xf32>, vector<8x512xf32>, vector<8x512xf32>, vector<8x512xf32>, vector<8x512xf32>, vector<8x512xf32>, vector<8x512xf32> -> vector<80x512xf32>
    %cst_17 = arith.constant dense<0.000000e+00> : vector<16x512xf32>
    %74 = tpu.matmul %40, %73, %cst_17 {dimension_numbers = #tpu.dot_dimension_numbers<[1], [0], [0], [1], [0, 0, 1, 1], [], []>, precision = #tpu.contract_precision<fp32>} : vector<16x80xf32>, vector<80x512xf32>, vector<16x512xf32> -> vector<16x512xf32>
    %75 = vector.extract_strided_slice %74 {offsets = [0, 0], sizes = [8, 512], strides = [1, 1]} : vector<16x512xf32> to vector<8x512xf32>
    %c0_18 = arith.constant 0 : index
    %c0_19 = arith.constant 0 : index
    %76 = vector.load %arg4[%c0_18, %c0_19] : memref<8x512xf32, #tpu.memory_space<vmem>>, vector<8x512xf32>
    tpu.vector_store %arg4[%c0_18, %c0_19], %75 {strides = array<i32>} : memref<8x512xf32, #tpu.memory_space<vmem>>, vector<8x512xf32>,
    %77 = vector.extract_strided_slice %74 {offsets = [8, 0], sizes = [8, 512], strides = [1, 1]} : vector<16x512xf32> to vector<8x512xf32>
    %c0_20 = arith.constant 0 : index
    %c0_21 = arith.constant 0 : index
    %78 = vector.load %arg5[%c0_20, %c0_21] : memref<8x512xf32, #tpu.memory_space<vmem>>, vector<8x512xf32>
    tpu.vector_store %arg5[%c0_20, %c0_21], %77 {strides = array<i32>} : memref<8x512xf32, #tpu.memory_space<vmem>>, vector<8x512xf32>,
    return
  }
}

</mosaic_0001>

<bundles_post_ra>
// kernel: tpu_custom_call.1
= control target key start
LH: loop header
LB: loop body
LE: loop exit
PB: predicated region body
PF: predicated region fallthrough
CT: control target
= control target key end

     0   :  { %11 = vsyncpa [#allocation3], 0  ;;  %s5959_s0 = inlined_call_operand.hbm [shape: f32[8,512], index: 0, kind: input, shape index: {}]   ;;  %s5960_s1 = inlined_call_operand.hbm [shape: f32[8,512], index: 1, kind: input, shape index: {}]   ;;  %s5961_s2 = inlined_call_operand.hbm [shape: f32[8,80], index: 2, kind: input, shape index: {}]   ;;  %s5962_s3 = inlined_call_operand.hbm [shape: f32[16,80], index: 3, kind: input, shape index: {}]   ;;  %s5963_s4 = inlined_call_operand.hbm [shape: f32[8,512], index: 4, kind: output, shape index: {0}]   ;;  %s5964_s5 = inlined_call_operand.hbm [shape: f32[8,512], index: 5, kind: output, shape index: {1}]  }
   0x1   :  { %12 = vsyncpa [#allocation6], 0 }
   0x2   :  { %13 = vsyncpa [#allocation9], 0 }
   0x3   :  { %14 = vsyncpa [#allocation4], 0 }
   0x4   :  { %15 = vsyncpa [#allocation12], 0  ;;  %s3970_s18 = smov [#allocation5]   ;;  %s3971_s20 = smov [#allocation2]  }
   0x5   :  { %s32_s19 = sshll.u32 %s3970_s18, 4  ;;  %s22_s21 = sshll.u32 %s3971_s20, 4  ;;  %s33_s19 = int_to_ptr.vmem [resolvable:$true] %s32_s19  ;;  %s23_s21 = int_to_ptr.vmem [resolvable:$true] %s22_s21 }
   0x6   :  { %s3828_s24 = scalar_lea.hbm %s5960_s1, 512 }
   0x7   :  { %p3829_p0 = scmp.ne.s32.totalorder %s5960_s1, %s3828_s24  ;;  %p3832_p1 = scmp.lt.u32.totalorder %s3828_s24, %s5960_s1 }
   0x9   :  { %p3834_p2 = pnand %p3832_p1, %p3829_p0 }
   0xb   :  { %3837 = shalt.err (!%p3834_p2)
}
   0xc   :  { %s3838_s29 = scalar_lea.vmem %s33_s19, 512  ;;  %p3843_p4 = scmp.lt.s32.totalorder %s33_s19, %s33_s19 }
   0xd   :  { %p3839_p3 = scmp.ne.s32.totalorder %s33_s19, %s3838_s29  ;;  %p3844_p5 = scmp.lt.s32.totalorder %s3838_s29, %s3838_s29 }
   0xf   :  { %p3845_p6 = por %p3844_p5, %p3843_p4 }
  0x11   :  { %p3846_p7 = pnand %p3845_p6, %p3839_p3 }
  0x13   :  { %3849 = shalt.err (!%p3846_p7)
}
  0x14   :  { %35 = dma.hbm_to_vmem [thread:$0]  %s5960_s1, 512, %s33_s19, [#allocation6]  }
  0x15   :  { %s3850_s9 = scalar_lea.hbm %s5959_s0, 512 }
  0x16   :  { %p3851_p8 = scmp.ne.s32.totalorder %s5959_s0, %s3850_s9  ;;  %p3854_p9 = scmp.lt.u32.totalorder %s3850_s9, %s5959_s0 }
  0x18   :  { %p3856_p10 = pnand %p3854_p9, %p3851_p8 }
  0x1a   :  { %3859 = shalt.err (!%p3856_p10)
}
  0x1b   :  { %s3860_s14 = scalar_lea.vmem %s23_s21, 512  ;;  %p3865_p12 = scmp.lt.s32.totalorder %s23_s21, %s23_s21 }
  0x1c   :  { %p3861_p11 = scmp.ne.s32.totalorder %s23_s21, %s3860_s14  ;;  %p3866_p13 = scmp.lt.s32.totalorder %s3860_s14, %s3860_s14 }
  0x1e   :  { %p3867_p0 = por %p3866_p13, %p3865_p12 }
  0x20   :  { %p3868_p1 = pnand %p3867_p0, %p3861_p11 }
  0x22   :  { %3871 = shalt.err (!%p3868_p1)
}
  0x23   :  { %25 = dma.hbm_to_vmem [thread:$0]  %s5959_s0, 512, %s23_s21, [#allocation3]  }
  0x24   :  { %s3972_s16 = smov [#allocation7]   ;;  %s3973_s18 = smov [#allocation8]  }
  0x25   :  { %s42_s17 = sshll.u32 %s3972_s16, 4  ;;  %s51_s19 = sshll.u32 %s3973_s18, 4  ;;  %s43_s17 = int_to_ptr.vmem [resolvable:$true] %s42_s17  ;;  %s4042_s19 = int_to_ptr.vmem [resolvable:$true] %s51_s19 }
  0x26   :  { %s3872_s23 = scalar_lea.hbm %s5961_s2, 128 }
  0x27   :  { %p3873_p2 = scmp.ne.s32.totalorder %s5961_s2, %s3872_s23  ;;  %p3876_p3 = scmp.lt.u32.totalorder %s3872_s23, %s5961_s2 }
  0x29   :  { %p3878_p4 = pnand %p3876_p3, %p3873_p2 }
  0x2b   :  { %3881 = shalt.err (!%p3878_p4)
}
  0x2c   :  { %s3882_s0 = scalar_lea.vmem %s43_s17, 128  ;;  %p3887_p6 = scmp.lt.s32.totalorder %s43_s17, %s43_s17 }
  0x2d   :  { %p3883_p5 = scmp.ne.s32.totalorder %s43_s17, %s3882_s0  ;;  %p3888_p7 = scmp.lt.s32.totalorder %s3882_s0, %s3882_s0 }
  0x2f   :  { %p3889_p8 = por %p3888_p7, %p3887_p6 }
  0x31   :  { %p3890_p9 = pnand %p3889_p8, %p3883_p5 }
  0x33   :  { %3893 = shalt.err (!%p3890_p9)
}
  0x34   :  { %45 = dma.hbm_to_vmem [thread:$0]  %s5961_s2, 128, %s43_s17, [#allocation6]  }
  0x35   :  { %s3894_s6 = scalar_lea.hbm %s5962_s3, 256 }
  0x36   :  { %p3895_p10 = scmp.ne.s32.totalorder %s5962_s3, %s3894_s6  ;;  %p3898_p11 = scmp.lt.u32.totalorder %s3894_s6, %s5962_s3 }
  0x38   :  { %p3900_p12 = pnand %p3898_p11, %p3895_p10 }
  0x3a   :  { %3903 = shalt.err (!%p3900_p12)
}
  0x3b   :  { %s3904_s11 = scalar_lea.vmem %s4042_s19, 256  ;;  %p3909_p0 = scmp.lt.s32.totalorder %s4042_s19, %s4042_s19 }
  0x3c   :  { %p3905_p13 = scmp.ne.s32.totalorder %s4042_s19, %s3904_s11  ;;  %p3910_p1 = scmp.lt.s32.totalorder %s3904_s11, %s3904_s11 }
  0x3e   :  { %p3911_p2 = por %p3910_p1, %p3909_p0 }
  0x40   :  { %p3912_p3 = pnand %p3911_p2, %p3905_p13 }
  0x42   :  { %3915 = shalt.err (!%p3912_p3)
}
  0x43   :  { %s3974_s2 = smov 128   ;;  %s3975_s12 = smov 8  }
  0x44   :  { %57 = dma.hbm_to_vmem [thread:$0]  %s5962_s3, 256, %s4042_s19, [#allocation9], %s3974_s2, %s3974_s2, %s3975_s12  }
  0x45   :  { %3960 = dma.done.wait [#allocation3], 512  }
  0x46   :  { %3961 = vsyncadd [#allocation3], 4294966784 }
  0x47   :  { %3962 = dma.done.wait [#allocation6], 640  }
  0x48   :  { %3963 = vsyncadd [#allocation6], 4294966656 }
  0x49   :  { %3964 = dma.done.wait [#allocation9], 256  }
  0x4a   :  { %3965 = vsyncadd [#allocation9], 4294967040  ;;  %v4073_v0 = vld [vmem:[#allocation5 + $0x10] sm:$0xff]  ;;  %v4075_v1 = vld [vmem:[#allocation5] sm:$0xff]  ;;  %s3976_s1 = smov 17   ;;  %s3977_s3 = smov 16   ;;  %v87_v5 = vlaneseq }
  0x4b   :  { %83 = vrot.lane.b32.xlu1 %v4073_v0, %s3976_s1  ;;  %79 = vrot.lane.b32.xlu0 %v4075_v1, %s3976_s1  ;;  %v4081_v2 = vld [vmem:[#allocation5 + $0x18] sm:$0xff]  ;;  %v4083_v3 = vld [vmem:[#allocation5 + $0x8] sm:$0xff]  ;;  %s3978_s15 = smov 15   ;;  %s3979_s16 = smov 1   ;;  %v5965_v4 = vmov 0.0   ;;  %v4152_v9 = vld [vmem:[#allocation2] sm:$0xff] }
  0x4c   :  { %s3980_s17 = smov 127   ;;  %s3981_s18 = smov 113   ;;  %431 = vmatprep.mubr.f32.mxu0 %v5965_v4  ;;  %1104 = vmatprep.mubr.f32.mxu1 %v5965_v4  ;;  %v4147_v6 = vshrl.u32 %v87_v5, 7  ;;  %v4149_v7 = vand.u32 127, %v87_v5  ;;  %v4154_v10 = vld [vmem:[#allocation2 + $0x18] sm:$0xff]  ;;  %v4156_v11 = vld [vmem:[#allocation2 + $0x8] sm:$0xff] }
  0x4d   :  { %s3982_s19 = smov 112   ;;  %s3983_s20 = smov 111   ;;  %v4159_v15 = vld [vmem:[#allocation2 + $0x10] sm:$0xff]  ;;  %v5967_v26 = vand.u32 4294901760, %v4075_v1  ;;  %v78_v32 = vld [vmem:[#allocation7] sm:$0xff]  ;;  %vm345_vm2 = vcmask 654336  }
  0x4e   :  { %6186 = vst [vmem:[#allocation18_spill] sm:$0xff] %v4149_v7  ;;  %v96_v8 = vsub.s32 0, %v4147_v6  ;;  %v129_v12 = vsub.s32 1, %v4147_v6  ;;  %v162_v16 = vsub.s32 2, %v4147_v6  ;;  %vm89_vm0 = vcmp.lt.s32.totalorder %v4149_v7, 17  ;;  %s3986_s22 = smov [#allocation10]  }
  0x4f   :  { %85 = vrot.lane.b32.xlu1 %v4081_v2, %s3976_s1  ;;  %81 = vrot.lane.b32.xlu0 %v4083_v3, %s3976_s1  ;;  %vm122_vm1 = vcmp.lt.s32.totalorder %v4149_v7, 16  ;;  %v195_v18 = vsub.s32 3, %v4147_v6  ;;  %v228_v31 = vsub.s32 4, %v4147_v6  ;;  %v5969_v40 = vand.u32 4294901760, %v4083_v3  ;;  %s3293_s23 = sshll.u32 %s3986_s22, 4  ;;  %s3987_s24 = smov [#allocation11]   ;;  %s3294_s23 = int_to_ptr.vmem [resolvable:$true] %s3293_s23 }
  0x50   :  { %v4164_v17 = vrot.slane %v4152_v9, %v96_v8  ;;  %v4169_v19 = vrot.slane %v4154_v10, %v96_v8  ;;  %v4172_v20 = vrot.slane %v4156_v11, %v96_v8  ;;  %v4175_v21 = vrot.slane %v4152_v9, %v129_v12  ;;  %s3303_s25 = sshll.u32 %s3987_s24, 4  ;;  %s3916_s26 = scalar_lea.vmem %s3294_s23, 512  ;;  %s3304_s25 = int_to_ptr.vmem [resolvable:$true] %s3303_s25 }
  0x51   :  { %v4178_v22 = vrot.slane %v4154_v10, %v129_v12  ;;  %v4181_v23 = vrot.slane %v4159_v15, %v96_v8  ;;  %v4184_v24 = vrot.slane %v4156_v11, %v129_v12  ;;  %v4187_v25 = vrot.slane %v4159_v15, %v129_v12  ;;  %p3917_p4 = scmp.ne.s32.totalorder %s3294_s23, %s3916_s26  ;;  %p3921_p5 = scmp.lt.s32.totalorder %s3294_s23, %s3294_s23 }
  0x52   :  { %6187 = vst [vmem:[#allocation19_spill] sm:$0xff] %v4164_v17  ;;  %6188 = vst [vmem:[#allocation20_spill] sm:$0xff] %v4169_v19  ;;  %v4191_v29 = vrot.slane %v4156_v11, %v162_v16  ;;  %v4194_v30 = vrot.slane %v4152_v9, %v162_v16  ;;  %v4200_v34 = vrot.slane %v4159_v15, %v162_v16  ;;  %v5970_v41 = vand.u32 4294901760, %v4081_v2  ;;  %p3922_p6 = scmp.lt.s32.totalorder %s3916_s26, %s3916_s26 }
  0x53   :  { %116 = vrot.lane.b32.xlu1 %v4083_v3, %s3977_s3  ;;  %114 = vrot.lane.b32.xlu0 %v4075_v1, %s3977_s3  ;;  %6189 = vst [vmem:[#allocation21_spill] sm:$0xff] %v4172_v20  ;;  %6190 = vst [vmem:[#allocation22_spill] sm:$0xff] %v4175_v21  ;;  %v4203_v35 = vrot.slane %v4154_v10, %v162_v16  ;;  %v4206_v36 = vrot.slane %v4156_v11, %v195_v18  ;;  %v5968_v43 = vand.u32 4294901760, %v4073_v0 }
  0x54   :  { %6191 = vst [vmem:[#allocation23_spill] sm:$0xff] %v4178_v22  ;;  %6192 = vst [vmem:[#allocation24_spill] sm:$0xff] %v4181_v23  ;;  %v4209_v37 = vrot.slane %v4152_v9, %v195_v18  ;;  %v4212_v38 = vrot.slane %v4159_v15, %v195_v18  ;;  %v4215_v39 = vrot.slane %v4154_v10, %v195_v18  ;;  %v347_v44 = vsel %vm345_vm2, %v78_v32, 0  ;;  %p3923_p7 = por %p3922_p6, %p3921_p5 }
  0x55   :  { %6193 = vst [vmem:[#allocation25_spill] sm:$0xff] %v4184_v24  ;;  %6194 = vst [vmem:[#allocation26_spill] sm:$0xff] %v4187_v25  ;;  %v4222_v42 = vsub.f32 %v4075_v1, %v5967_v26  ;;  %v4230_v48 = vrot.slane %v4152_v9, %v228_v31  ;;  %v4233_v49 = vrot.slane %v4154_v10, %v228_v31  ;;  %vm155_vm3 = vcmp.lt.s32.totalorder %v4149_v7, 15 }
  0x56   :  { %6195 = vst [vmem:[#allocation27_spill] sm:$0xff] %v4191_v29  ;;  %6196 = vst [vmem:[#allocation28_spill] sm:$0xff] %v4194_v30  ;;  %v4236_v50 = vrot.slane %v4156_v11, %v228_v31  ;;  %v4248_v55 = vrot.slane %v4159_v15, %v228_v31  ;;  %v261_v56 = vsub.s32 5, %v4147_v6  ;;  %v4254_v57 = vsub.f32 %v4083_v3, %v5969_v40  ;;  %p3924_p8 = pnand %p3923_p7, %p3917_p4 }
  0x57   :  { %120 = vrot.lane.b32.xlu1 %v4081_v2, %s3977_s3  ;;  %118 = vrot.lane.b32.xlu0 %v4073_v0, %s3977_s3  ;;  %6197 = vst [vmem:[#allocation29_spill] sm:$0xff] %v4200_v34  ;;  %6198 = vst [vmem:[#allocation30_spill] sm:$0xff] %v4203_v35  ;;  %v4256_v58 = vand.u32 4294901760, %v347_v44  ;;  %v4264_v60 = vsub.f32 %v4081_v2, %v5970_v41  ;;  %v4269_v61 = vsub.f32 %v4073_v0, %v5968_v43 }
  0x58   :  { %6199 = vst [vmem:[#allocation31_spill] sm:$0xff] %v4206_v36  ;;  %6200 = vst [vmem:[#allocation32_spill] sm:$0xff] %v4209_v37  ;;  %v5973_v62 = vand.u32 4294901760, %v4222_v42  ;;  %vm188_vm4 = vcmp.lt.s32.totalorder %v4149_v7, 1  ;;  %v327_v41 = vsub.s32 7, %v4147_v6  ;;  %vm221_vm5 = vcmp.lt.s32.totalorder %v4149_v7, 127 }
  0x59   :  { %6201 = vst [vmem:[#allocation33_spill] sm:$0xff] %v4212_v38  ;;  %6202 = vst [vmem:[#allocation34_spill] sm:$0xff] %v4215_v39  ;;  %vm287_vm6 = vcmp.lt.s32.totalorder %v4149_v7, 112  ;;  %vm254_vm7 = vcmp.lt.s32.totalorder %v4149_v7, 113  ;;  %vm320_vm8 = vcmp.lt.s32.totalorder %v4149_v7, 111 }
  0x5a   :  { %6203 = vst [vmem:[#allocation35_spill] sm:$0xff] %v4222_v42  ;;  %6204 = vst [vmem:[#allocation36_spill] sm:$0xff] %v4230_v48  ;;  %v4319_v43 = vsub.f32 %v4222_v42, %v5973_v62 }
  0x5b   :  { %149 = vrot.lane.b32.xlu1 %v4083_v3, %s3978_s15  ;;  %147 = vrot.lane.b32.xlu0 %v4075_v1, %s3978_s15  ;;  %6205 = vst [vmem:[#allocation37_spill] sm:$0xff] %v4233_v49  ;;  %6206 = vst [vmem:[#allocation38_spill] sm:$0xff] %v4236_v50 }
  0x5c   :  { %6207 = vst [vmem:[#allocation39_spill] sm:$0xff] %v4248_v55  ;;  %6208 = vst [vmem:[#allocation40_spill] sm:$0xff] %v4254_v57 }
  0x5d   :  { %6209 = vst [vmem:[#allocation41_spill] sm:$0xff] %v4256_v58  ;;  %6210 = vst [vmem:[#allocation42_spill] sm:$0xff] %v4264_v60 }
  0x5e   :  { %6211 = vst [vmem:[#allocation43_spill] sm:$0xff] %v4269_v61 }
  0x5f   :  { %153 = vrot.lane.b32.xlu1 %v4081_v2, %s3978_s15  ;;  %151 = vrot.lane.b32.xlu0 %v4073_v0, %s3978_s15 }
  0x63   :  { %182 = vrot.lane.b32.xlu1 %v4083_v3, %s3979_s16  ;;  %180 = vrot.lane.b32.xlu0 %v4075_v1, %s3979_s16 }
  0x67   :  { %186 = vrot.lane.b32.xlu1 %v4081_v2, %s3979_s16  ;;  %184 = vrot.lane.b32.xlu0 %v4073_v0, %s3979_s16 }
  0x6b   :  { %215 = vrot.lane.b32.xlu1 %v4083_v3, %s3980_s17  ;;  %213 = vrot.lane.b32.xlu0 %v4075_v1, %s3980_s17 }
  0x6f   :  { %219 = vrot.lane.b32.xlu1 %v4081_v2, %s3980_s17  ;;  %217 = vrot.lane.b32.xlu0 %v4073_v0, %s3980_s17 }
  0x73   :  { %248 = vrot.lane.b32.xlu1 %v4083_v3, %s3981_s18  ;;  %246 = vrot.lane.b32.xlu0 %v4075_v1, %s3981_s18 }
  0x77   :  { %252 = vrot.lane.b32.xlu1 %v4081_v2, %s3981_s18  ;;  %250 = vrot.lane.b32.xlu0 %v4073_v0, %s3981_s18 }
  0x7b   :  { %281 = vrot.lane.b32.xlu1 %v4083_v3, %s3982_s19  ;;  %279 = vrot.lane.b32.xlu0 %v4075_v1, %s3982_s19 }
  0x7f   :  { %285 = vrot.lane.b32.xlu1 %v4081_v2, %s3982_s19  ;;  %283 = vrot.lane.b32.xlu0 %v4073_v0, %s3982_s19 }
  0x83   :  { %314 = vrot.lane.b32.xlu1 %v4083_v3, %s3983_s20  ;;  %312 = vrot.lane.b32.xlu0 %v4075_v1, %s3983_s20 }
  0x87   :  { %318 = vrot.lane.b32.xlu1 %v4081_v2, %s3983_s20  ;;  %316 = vrot.lane.b32.xlu0 %v4073_v0, %s3983_s20 }
  0xbd   :  { %v84_v13 = vpop.permute.xlu1 %83  ;;  %v80_v14 = vpop.permute.xlu0 %79 }
  0xc1   :  { %v86_v27 = vpop.permute.xlu1 %85  ;;  %v82_v28 = vpop.permute.xlu0 %81 }
  0xc2   :  { %v92_v33 = vsel %vm89_vm0, %v80_v14, %v82_v28  ;;  %v90_v51 = vsel %vm89_vm0, %v84_v13, %v86_v27  ;;  %v93_v52 = vsel %vm89_vm0, %v86_v27, %v80_v14  ;;  %v91_v53 = vsel %vm89_vm0, %v82_v28, %v84_v13 }
  0xc3   :  { %v4227_v45 = vmul.f32 %v4172_v20, %v92_v33  ;;  %v110_v63 = vmul.f32 %v4164_v17, %v93_v52  ;;  %v4274_v5 = vmul.f32 %v4169_v19, %v90_v51  ;;  %v4277_v8 = vmul.f32 %v4181_v23, %v91_v53 }
  0xc4   :  { %v4295_v33 = vsub.f32 %v347_v44, %v4256_v58  ;;  %v5976_v51 = vand.u32 4294901760, %v4254_v57  ;;  %v5981_v52 = vand.u32 4294901760, %v4264_v60  ;;  %v4360_v23 = vrot.slane %v4156_v11, %v261_v56 }
  0xc5   :  { %v117_v46 = vpop.permute.xlu1 %116  ;;  %v115_v47 = vpop.permute.xlu0 %114  ;;  %v5972_v12 = vand.u32 4294901760, %v4227_v45  ;;  %v1024_v4 = vand.u32 4294901760, %v4277_v8 }
  0xc6   :  { %v125_v54 = vsel %vm122_vm1, %v115_v47, %v117_v46  ;;  %6212 = vst [vmem:[#allocation44_spill] sm:$0xff] %v4295_v33  ;;  %6221 = vst [vmem:[#allocation52_spill] sm:$0xff] %v4360_v23 }
  0xc7   :  { %v4259_v59 = vmul.f32 %v4184_v24, %v125_v54  ;;  %v351_v54 = vand.u32 4294901760, %v110_v63  ;;  %v4383_v24 = vrot.slane %v4152_v9, %v327_v41 }
  0xc9   :  { %v121_v13 = vpop.permute.xlu1 %120  ;;  %v119_v14 = vpop.permute.xlu0 %118  ;;  %v5971_v16 = vand.u32 4294901760, %v4259_v59  ;;  %6227 = vst [vmem:[#allocation58_spill] sm:$0xff] %v4383_v24 }
  0xca   :  { %v126_v18 = vsel %vm122_vm1, %v121_v13, %v115_v47  ;;  %v123_v27 = vsel %vm122_vm1, %v119_v14, %v121_v13  ;;  %v124_v28 = vsel %vm122_vm1, %v117_v46, %v119_v14 }
  0xcb   :  { %v4288_v31 = vmul.f32 %v4175_v21, %v126_v18  ;;  %v4291_v32 = vmul.f32 %v4187_v25, %v124_v28  ;;  %v4299_v47 = vmul.f32 %v4178_v22, %v123_v27  ;;  %v4305_v46 = vpack.c.bf16 %v5971_v16, %v5972_v12 }
  0xcc   :  { %v294_v27 = vsub.s32 6, %v4147_v6  ;;  %v1022_v28 = vand.u32 4294901760, %v4274_v5  ;;  %v4327_v16 = vand.u32 4294901760, %v4295_v33  ;;  %v4332_v12 = vsub.f32 %v4254_v57, %v5976_v51 }
  0xcd   :  { %6213 = vst [vmem:[#allocation45_spill] sm:$0xff] %v4305_v46  ;;  %v5974_v13 = vand.u32 4294901760, %v4288_v31  ;;  %v5979_v44 = vand.u32 4294901760, %v4291_v32  ;;  %v150_v14 = vpop.permute.xlu1 %149  ;;  %v148_v18 = vpop.permute.xlu0 %147  ;;  %v5978_v26 = vand.u32 4294901760, %v4299_v47  ;;  %3319 = vmatprep.subr.bf16.mxu0 %v4305_v46  ;;  %v4345_v6 = vsub.f32 %v4264_v60, %v5981_v52 }
  0xce   :  { %6215 = vst [vmem:[#allocation47_spill] sm:$0xff] %v4327_v16  ;;  %v4363_v52 = vrot.slane %v4159_v15, %v261_v56  ;;  %v4369_v25 = vrot.slane %v4152_v9, %v294_v27  ;;  %v4372_v19 = vrot.slane %v4154_v10, %v294_v27  ;;  %v4375_v17 = vrot.slane %v4156_v11, %v294_v27 }
  0xcf   :  { %v4323_v40 = vpack.c.bf16 %v5974_v13, %v351_v54  ;;  %v4336_v53 = vpack.c.bf16 %v5978_v26, %v1022_v28  ;;  %v4340_v62 = vpack.c.bf16 %v5979_v44, %v1024_v4  ;;  %v6218_v13 = vand.u32 4294901760, %v4269_v61 }
  0xd0   :  { %v4354_v26 = vrot.slane %v4152_v9, %v261_v56  ;;  %v4357_v44 = vrot.slane %v4154_v10, %v261_v56  ;;  %6222 = vst [vmem:[#allocation53_spill] sm:$0xff] %v4363_v52  ;;  %6223 = vst [vmem:[#allocation54_spill] sm:$0xff] %v4369_v25  ;;  %v4380_v56 = vrot.slane %v4159_v15, %v294_v27 }
  0xd1   :  { %6214 = vst [vmem:[#allocation46_spill] sm:$0xff] %v4323_v40  ;;  %6216 = vst [vmem:[#allocation48_spill] sm:$0xff] %v4336_v53  ;;  %v4350_v22 = vsub.f32 %v4269_v61, %v6218_v13  ;;  %v154_v51 = vpop.permute.xlu1 %153  ;;  %v152_v21 = vpop.permute.xlu0 %151  ;;  %3321 = vmatpush1.bf16.msra.mxu0 %v4323_v40  ;;  %v158_v13 = vsel %vm155_vm3, %v148_v18, %v150_v14  ;;  %3427 = vmatprep.subr.bf16.mxu1 %v4336_v53 }
  0xd2   :  { %6217 = vst [vmem:[#allocation49_spill] sm:$0xff] %v4340_v62  ;;  %6219 = vst [vmem:[#allocation50_spill] sm:$0xff] %v4354_v26  ;;  %3429 = vmatpush1.bf16.msra.mxu1 %v4340_v62  ;;  %v435_v20 = vsub.f32 %v4295_v33, %v4327_v16  ;;  %v4388_v53 = vsub.f32 %v110_v63, %v351_v54  ;;  %v4394_v42 = vmul.f32 %v4191_v29, %v158_v13 }
  0xd3   :  { %6220 = vst [vmem:[#allocation51_spill] sm:$0xff] %v4357_v44  ;;  %6224 = vst [vmem:[#allocation55_spill] sm:$0xff] %v4372_v19  ;;  %v4397_v9 = vrot.slane %v4154_v10, %v327_v41  ;;  %v4400_v16 = vrot.slane %v4156_v11, %v327_v41  ;;  %v4403_v63 = vrot.slane %v4159_v15, %v327_v41 }
  0xd4   :  { %6225 = vst [vmem:[#allocation56_spill] sm:$0xff] %v4375_v17  ;;  %6226 = vst [vmem:[#allocation57_spill] sm:$0xff] %v4380_v56  ;;  %v159_v54 = vsel %vm155_vm3, %v154_v51, %v148_v18  ;;  %v157_v62 = vsel %vm155_vm3, %v150_v14, %v152_v21  ;;  %v4412_v40 = vsub.f32 %v4277_v8, %v1024_v4  ;;  %v4419_v15 = vand.u32 4294901760, %v435_v20 }
  0xd5   :  { %v183_v27 = vpop.permute.xlu1 %182  ;;  %v181_v60 = vpop.permute.xlu0 %180  ;;  %6228 = vst [vmem:[#allocation59_spill] sm:$0xff] %v4397_v9  ;;  %6229 = vst [vmem:[#allocation60_spill] sm:$0xff] %v4400_v16  ;;  %v156_v10 = vsel %vm155_vm3, %v152_v21, %v154_v51  ;;  %v4423_v18 = vsub.f32 %v4274_v5, %v1022_v28  ;;  %v6232_v14 = vand.u32 4294901760, %v4227_v45  ;;  %v6233_v4 = vand.u32 4294901760, %v4259_v59 }
  0xd6   :  { %6230 = vst [vmem:[#allocation61_spill] sm:$0xff] %v4403_v63  ;;  %v191_v13 = vsel %vm188_vm4, %v181_v60, %v183_v27  ;;  %6231 = vst [vmem:[#allocation62_spill] sm:$0xff] %v4412_v40  ;;  %v357_v21 = vand.u32 4294901760, %v4394_v42  ;;  %v176_v20 = vmul.f32 %v4194_v30, %v159_v54  ;;  %v178_v51 = vmul.f32 %v4200_v34, %v157_v62 }
  0xd7   :  { %v4417_v11 = vmul.f32 %v4206_v36, %v191_v13  ;;  %v4428_v61 = vsub.f32 %v4227_v45, %v6232_v14  ;;  %v4433_v8 = vsub.f32 %v4259_v59, %v6233_v4  ;;  %v4440_v46 = vmul.f32 %v4203_v35, %v156_v10 }
  0xd8   :  { %v6234_v62 = vand.u32 4294901760, %v4288_v31 }
  0xd9   :  { %v6005_v13 = vand.u32 4294901760, %v4417_v11  ;;  %v187_v5 = vpop.permute.xlu1 %186  ;;  %v185_v28 = vpop.permute.xlu0 %184 }
  0xda   :  { %v192_v45 = vsel %vm188_vm4, %v187_v5, %v181_v60  ;;  %v189_v59 = vsel %vm188_vm4, %v185_v28, %v187_v5  ;;  %v190_v14 = vsel %vm188_vm4, %v183_v27, %v185_v28  ;;  %v4452_v4 = vsub.f32 %v4288_v31, %v6234_v62 }
  0xdb   :  { %v4455_v41 = vmul.f32 %v4209_v37, %v192_v45  ;;  %v4458_v10 = vmul.f32 %v4212_v38, %v190_v14  ;;  %v6235_v60 = vand.u32 4294901760, %v4291_v32  ;;  %v4466_v27 = vmul.f32 %v4215_v39, %v189_v59 }
  0xdc   :  { %v4470_v28 = vpack.c.bf16 %v6005_v13, %v357_v21  ;;  %v6238_v45 = vand.u32 4294901760, %v4299_v47  ;;  %v359_v14 = vand.u32 4294901760, %v176_v20  ;;  %v1030_v59 = vand.u32 4294901760, %v4440_v46 }
  0xdd   :  { %v4463_v5 = vsub.f32 %v4291_v32, %v6235_v60  ;;  %v363_v54 = vand.u32 4294901760, %v4455_v41  ;;  %v216_v60 = vpop.permute.xlu1 %215  ;;  %v214_v37 = vpop.permute.xlu0 %213  ;;  %v1032_v39 = vand.u32 4294901760, %v178_v51  ;;  %v6240_v38 = vand.u32 4294901760, %v4388_v53 }
  0xde   :  { %6237 = vst [vmem:[#allocation64_spill] sm:$0xff] %v4470_v28  ;;  %v4476_v62 = vsub.f32 %v4299_v47, %v6238_v45  ;;  %v224_v31 = vsel %vm221_vm5, %v214_v37, %v216_v60  ;;  %3323 = vmatprep.subr.bf16.mxu0 %v4470_v28  ;;  %v6241_v30 = vand.u32 4294901760, %v4466_v27  ;;  %v6243_v29 = vand.u32 4294901760, %v4458_v10 }
  0xdf   :  { %6236 = vst [vmem:[#allocation63_spill] sm:$0xff] %v4463_v5  ;;  %v4486_v45 = vpack.c.bf16 %v363_v54, %v359_v14  ;;  %v4493_v35 = vsub.f32 %v4388_v53, %v6240_v38  ;;  %v6245_v28 = vand.u32 4294901760, %v4412_v40  ;;  %v4510_v32 = vmul.f32 %v4230_v48, %v224_v31 }
  0xe0   :  { %v4498_v36 = vpack.c.bf16 %v6241_v30, %v1030_v59  ;;  %v4502_v47 = vpack.c.bf16 %v6243_v29, %v1032_v39  ;;  %v6246_v13 = vand.u32 4294901760, %v4433_v8  ;;  %v4517_v29 = vsub.f32 %v176_v20, %v359_v14 }
  0xe1   :  { %6239 = vst [vmem:[#allocation65_spill] sm:$0xff] %v4486_v45  ;;  %v4507_v34 = vsub.f32 %v4412_v40, %v6245_v28  ;;  %v220_v38 = vpop.permute.xlu1 %219  ;;  %v218_v33 = vpop.permute.xlu0 %217  ;;  %3325 = vmatpush1.bf16.msra.mxu0 %v4486_v45  ;;  %v6248_v48 = vand.u32 4294901760, %v4452_v4  ;;  %v6250_v14 = vand.u32 4294901760, %v4463_v5  ;;  %v371_v57 = vand.u32 4294901760, %v4510_v32 }
  0xe2   :  { %6242 = vst [vmem:[#allocation66_spill] sm:$0xff] %v4498_v36  ;;  %6244 = vst [vmem:[#allocation67_spill] sm:$0xff] %v4502_v47  ;;  %v458_v30 = vsub.f32 %v4433_v8, %v6246_v13  ;;  %v225_v58 = vsel %vm221_vm5, %v220_v38, %v214_v37  ;;  %v222_v28 = vsel %vm221_vm5, %v218_v33, %v220_v38  ;;  %3431 = vmatprep.subr.bf16.mxu1 %v4498_v36 }
  0xe3   :  { %6247 = vst [vmem:[#allocation68_spill] sm:$0xff] %v4517_v29  ;;  %v223_v31 = vsel %vm221_vm5, %v216_v60, %v218_v33  ;;  %v464_v45 = vsub.f32 %v4452_v4, %v6248_v48  ;;  %v4530_v13 = vsub.f32 %v4394_v42, %v357_v21  ;;  %v4533_v20 = vmul.f32 %v4233_v49, %v225_v58 }
  0xe4   :  { %3433 = vmatpush1.bf16.msra.mxu1 %v4502_v47  ;;  %v6249_v37 = vand.u32 4294901760, %v4428_v61  ;;  %v1137_v60 = vsub.f32 %v4463_v5, %v6250_v14  ;;  %v4544_v48 = vmul.f32 %v4236_v50, %v223_v31  ;;  %v4547_v42 = vmul.f32 %v4248_v55, %v222_v28 }
  0xe5   :  { %v6251_v58 = vand.u32 4294901760, %v4423_v18  ;;  %v4552_v38 = vsub.f32 %v178_v51, %v1032_v39  ;;  %v249_v49 = vpop.permute.xlu1 %248  ;;  %v247_v14 = vpop.permute.xlu0 %246  ;;  %v6253_v31 = vand.u32 4294901760, %v4476_v62  ;;  %v459_v39 = vand.u32 4294901760, %v458_v30 }
  0xe6   :  { %v446_v33 = vsub.f32 %v4428_v61, %v6249_v37  ;;  %v6034_v55 = vand.u32 4294901760, %v4544_v48  ;;  %v6254_v51 = vand.u32 4294901760, %v4417_v11  ;;  %v6255_v37 = vand.u32 4294901760, %v4081_v2 }
  0xe7   :  { %v1119_v21 = vsub.f32 %v4423_v18, %v6251_v58  ;;  %6252 = vst [vmem:[#allocation69_spill] sm:$0xff] %v4552_v38  ;;  %v1131_v50 = vsub.f32 %v4476_v62, %v6253_v31  ;;  %v6256_v36 = vand.u32 4294901760, %v4533_v20  ;;  %v465_v40 = vand.u32 4294901760, %v464_v45 }
  0xe8   :  { %v4566_v47 = vsub.f32 %v4417_v11, %v6254_v51  ;;  %v6035_v31 = vand.u32 4294901760, %v4530_v13  ;;  %v4576_v28 = vsub.f32 %v4440_v46, %v1030_v59  ;;  %v4579_v58 = vsub.f32 %v4455_v41, %v363_v54 }
  0xe9   :  { %v4572_v5 = vpack.c.bf16 %v6256_v36, %v6255_v37  ;;  %v6260_v30 = vand.u32 4294901760, %v4083_v3  ;;  %v6262_v2 = vand.u32 4294901760, %v4073_v0  ;;  %v6263_v36 = vand.u32 4294901760, %v4547_v42  ;;  %v253_v51 = vpop.permute.xlu1 %252  ;;  %v251_v46 = vpop.permute.xlu0 %250 }
  0xea   :  { %6258 = vst [vmem:[#allocation71_spill] sm:$0xff] %v4576_v28  ;;  %6259 = vst [vmem:[#allocation72_spill] sm:$0xff] %v4579_v58  ;;  %v6265_v41 = vand.u32 4294901760, %v4075_v1  ;;  %v1132_v3 = vand.u32 4294901760, %v1131_v50  ;;  %v1138_v59 = vand.u32 4294901760, %v1137_v60  ;;  %v6268_v45 = vand.u32 4294901760, %v4458_v10 }
  0xeb   :  { %6257 = vst [vmem:[#allocation70_spill] sm:$0xff] %v4572_v5  ;;  %v4585_v11 = vpack.c.bf16 %v6034_v55, %v6260_v30  ;;  %v4591_v37 = vpack.c.bf16 %v6263_v36, %v6262_v2  ;;  %3435 = vmatprep.subr.bf16.mxu1 %v4572_v5  ;;  %v6267_v30 = vand.u32 4294901760, %v4517_v29  ;;  %v447_v2 = vand.u32 4294901760, %v446_v33 }
  0xec   :  { %v4597_v54 = vpack.c.bf16 %v371_v57, %v6265_v41  ;;  %v1120_v36 = vand.u32 4294901760, %v1119_v21  ;;  %v453_v55 = vand.u32 4294901760, %v4493_v35  ;;  %v4610_v1 = vsub.f32 %v4458_v10, %v6268_v45 }
  0xed   :  { %6261 = vst [vmem:[#allocation73_spill] sm:$0xff] %v4585_v11  ;;  %6264 = vst [vmem:[#allocation74_spill] sm:$0xff] %v4591_v37  ;;  %v4602_v0 = vsub.f32 %v4517_v29, %v6267_v30  ;;  %3327 = vmatprep.subr.bf16.mxu0 %v4585_v11  ;;  %3437 = vmatpush1.bf16.msra.mxu1 %v4591_v37  ;;  %v1126_v50 = vand.u32 4294901760, %v4507_v34  ;;  %v4618_v60 = vsub.f32 %v4530_v13, %v6035_v31  ;;  %v282_v37 = vpop.permute.xlu1 %281  ;;  %v280_v33 = vpop.permute.xlu0 %279 }
  0xee   :  { %6266 = vst [vmem:[#allocation75_spill] sm:$0xff] %v4597_v54  ;;  %6269 = vst [vmem:[#allocation76_spill] sm:$0xff] %v4610_v1  ;;  %3329 = vmatpush1.bf16.msra.mxu0 %v4597_v54  ;;  %v6040_v35 = vand.u32 4294901760, %v4579_v58  ;;  %v4622_v21 = vpack.c.bf16 %v459_v39, %v447_v2  ;;  %v4624_v41 = vpack.c.bf16 %v465_v40, %v453_v55  ;;  %v6270_v45 = vand.u32 4294901760, %v4552_v38 }
  0xef   :  { %v6271_v34 = vand.u32 4294901760, %v4466_v27  ;;  %v4637_v54 = vpack.c.bf16 %v1132_v3, %v1120_v36  ;;  %v4639_v39 = vpack.c.bf16 %v1138_v59, %v1126_v50  ;;  %v258_v40 = vsel %vm254_vm7, %v253_v51, %v247_v14 }
  0xf0   :  { %v4630_v30 = vsub.f32 %v4552_v38, %v6270_v45  ;;  %v256_v55 = vsel %vm254_vm7, %v249_v49, %v251_v46  ;;  %v290_v2 = vsel %vm287_vm6, %v280_v33, %v282_v37  ;;  %v471_v3 = vand.u32 4294901760, %v4618_v60 }
  0xf1   :  { %v4635_v31 = vsub.f32 %v4466_v27, %v6271_v34  ;;  %v255_v34 = vsel %vm254_vm7, %v251_v46, %v253_v51  ;;  %v6273_v59 = vand.u32 4294901760, %v4566_v47  ;;  %v4658_v50 = vsub.f32 %v4579_v58, %v6040_v35  ;;  %v286_v35 = vpop.permute.xlu1 %285  ;;  %v284_v5 = vpop.permute.xlu0 %283 }
  0xf2   :  { %v4661_v10 = vsub.f32 %v4510_v32, %v371_v57  ;;  %v257_v45 = vsel %vm254_vm7, %v247_v14, %v249_v49  ;;  %v6274_v27 = vand.u32 4294901760, %v4576_v28  ;;  %v278_v46 = vmul.f32 %v4357_v44, %v258_v40 }
  0xf3   :  { %6272 = vst [vmem:[#allocation77_spill] sm:$0xff] %v4635_v31  ;;  %v482_v36 = vsub.f32 %v4566_v47, %v6273_v59  ;;  %v4672_v60 = vmul.f32 %v4360_v23, %v256_v55  ;;  %v308_v59 = vmul.f32 %v4369_v25, %v290_v2  ;;  %v4677_v32 = vmul.f32 %v4363_v52, %v255_v34 }
  0xf4   :  { %v4668_v51 = vsub.f32 %v4576_v28, %v6274_v27  ;;  %v291_v49 = vsel %vm287_vm6, %v286_v35, %v280_v33  ;;  %v288_v14 = vsel %vm287_vm6, %v284_v5, %v286_v35  ;;  %v289_v40 = vsel %vm287_vm6, %v282_v37, %v284_v5 }
  0xf5   :  { %v4686_v55 = vmul.f32 %v4354_v26, %v257_v45  ;;  %v311_v2 = vmul.f32 %v4372_v19, %v291_v49  ;;  %v309_v27 = vmul.f32 %v4375_v17, %v289_v40  ;;  %v310_v57 = vmul.f32 %v4380_v56, %v288_v14  ;;  %v315_v40 = vpop.permute.xlu1 %314  ;;  %v313_v17 = vpop.permute.xlu0 %312 }
  0xf6   :  { %v6275_v34 = vand.u32 4294901760, %v4610_v1  ;;  %v6276_v35 = vand.u32 4294901760, %v4544_v48  ;;  %v483_v37 = vand.u32 4294901760, %v482_v36  ;;  %v379_v45 = vand.u32 4294901760, %v308_v59 }
  0xf7   :  { %v1050_v52 = vand.u32 4294901760, %v311_v2  ;;  %v377_v49 = vand.u32 4294901760, %v309_v27  ;;  %v1052_v19 = vand.u32 4294901760, %v310_v57  ;;  %v1046_v14 = vand.u32 4294901760, %v278_v46 }
  0xf8   :  { %v4694_v44 = vsub.f32 %v4610_v1, %v6275_v34  ;;  %v4700_v5 = vsub.f32 %v4544_v48, %v6276_v35  ;;  %v373_v56 = vand.u32 4294901760, %v4672_v60  ;;  %v1048_v34 = vand.u32 4294901760, %v4677_v32 }
  0xf9   :  { %v323_v33 = vsel %vm320_vm8, %v313_v17, %v315_v40  ;;  %v6277_v26 = vand.u32 4294901760, %v4533_v20  ;;  %v6278_v36 = vand.u32 4294901760, %v4547_v42  ;;  %v375_v23 = vand.u32 4294901760, %v4686_v55  ;;  %v317_v29 = vpop.permute.xlu0 %316 }
  0xfa   :  { %v6279_v25 = vand.u32 4294901760, %v4635_v31  ;;  %v4723_v1 = vmul.f32 %v4383_v24, %v323_v33  ;;  %v4725_v38 = vpack.c.bf16 %v377_v49, %v373_v56  ;;  %v4727_v58 = vpack.c.bf16 %v1050_v52, %v1046_v14 }
  0xfb   :  { %v4709_v48 = vsub.f32 %v4533_v20, %v6277_v26  ;;  %v4714_v35 = vsub.f32 %v4547_v42, %v6278_v36  ;;  %v4729_v26 = vpack.c.bf16 %v1052_v19, %v1048_v34  ;;  %v319_v20 = vpop.permute.xlu1 %318  ;;  %v4731_v42 = vpack.c.bf16 %v379_v45, %v375_v23 }
  0xfc   :  { %v4720_v11 = vsub.f32 %v4635_v31, %v6279_v25  ;;  %v4733_v36 = vpack.c.bf16 %v483_v37, %v471_v3  ;;  %v1144_v28 = vand.u32 4294901760, %v4668_v51  ;;  %v489_v25 = vand.u32 4294901760, %v4658_v50  ;;  %3331 = vmatprep.subr.bf16.mxu0 %v4725_v38  ;;  %3439 = vmatprep.subr.bf16.mxu1 %v4727_v58 }
  0xfd   :  { %6280 = vst [vmem:[#allocation78_spill] sm:$0xff] %v4729_v26  ;;  %v324_v33 = vsel %vm320_vm8, %v319_v20, %v313_v17  ;;  %v321_v24 = vsel %vm320_vm8, %v317_v29, %v319_v20  ;;  %v322_v31 = vsel %vm320_vm8, %v315_v40, %v317_v29  ;;  %3333 = vmatpush1.bf16.msra.mxu0 %v4731_v42  ;;  %v383_v29 = vand.u32 4294901760, %v4723_v1 }
  0xfe   :  { %v344_v51 = vmul.f32 %v4397_v9, %v324_v33  ;;  %v342_v50 = vmul.f32 %v4400_v16, %v322_v31  ;;  %v4751_v20 = vsub.f32 %v309_v27, %v377_v49  ;;  %v343_v40 = vmul.f32 %v4403_v63, %v321_v24  ;;  %3441 = vmatpush1.bf16.msra.mxu1 %v4729_v26 }
  0xff   :  { %v1156_v3 = vand.u32 4294901760, %v4720_v11  ;;  %v4757_v7 = vsub.f32 %v311_v2, %v1050_v52  ;;  %v1162_v31 = vand.u32 4294901760, %v4694_v44  ;;  %v4760_v9 = vsub.f32 %v278_v46, %v1046_v14 }
 0x100   :  { %v1054_v37 = vand.u32 4294901760, %v344_v51  ;;  %v381_v33 = vand.u32 4294901760, %v342_v50  ;;  %v4762_v16 = vsub.f32 %v308_v59, %v379_v45  ;;  %v1056_v27 = vand.u32 4294901760, %v343_v40 }
 0x101   :  { %v6281_v49 = vand.u32 4294901760, %v4700_v5  ;;  %v4768_v24 = vsub.f32 %v4672_v60, %v373_v56  ;;  %v6071_v63 = vmov 1.0   ;;  %v6284_v44 = vand.u32 4294901760, %v4709_v48 }
 0x102   :  { %v4771_v52 = vpack.c.bf16 %v6071_v63, %v381_v33  ;;  %v4774_v11 = vpack.c.bf16 %v6071_v63, %v1054_v37  ;;  %v4779_v59 = vsub.f32 %v310_v57, %v1052_v19  ;;  %v4782_v2 = vpack.c.bf16 %v6071_v63, %v383_v29 }
 0x103   :  { %v506_v17 = vsub.f32 %v4700_v5, %v6281_v49  ;;  %v1179_v46 = vsub.f32 %v4709_v48, %v6284_v44  ;;  %v4785_v45 = vpack.c.bf16 %v6071_v63, %v1056_v27  ;;  %v6287_v60 = vand.u32 4294901760, %v4661_v10 }
 0x104   :  { %6282 = vst [vmem:[#allocation79_spill] sm:$0xff] %v4771_v52  ;;  %6283 = vst [vmem:[#allocation80_spill] sm:$0xff] %v4774_v11  ;;  %v4792_v49 = vsub.f32 %v4686_v55, %v375_v23  ;;  %3335 = vmatprep.subr.bf16.mxu0 %v4771_v52  ;;  %3443 = vmatprep.subr.bf16.mxu1 %v4774_v11  ;;  %v1150_v19 = vand.u32 4294901760, %v4630_v30  ;;  %v6288_v44 = vand.u32 4294901760, %v4714_v35  ;;  %v6289_v30 = vand.u32 4294901760, %v4602_v0 }
 0x105   :  { %6285 = vst [vmem:[#allocation81_spill] sm:$0xff] %v4782_v2  ;;  %6286 = vst [vmem:[#allocation82_spill] sm:$0xff] %v4785_v45  ;;  %v512_v14 = vsub.f32 %v4661_v10, %v6287_v60  ;;  %v4802_v56 = vsub.f32 %v4677_v32, %v1048_v34  ;;  %3337 = vmatpush1.bf16.msra.mxu0 %v4782_v2  ;;  %3445 = vmatpush1.bf16.msra.mxu1 %v4785_v45  ;;  %v507_v23 = vand.u32 4294901760, %v506_v17 }
 0x106   :  { %v1185_v63 = vsub.f32 %v4714_v35, %v6288_v44  ;;  %3339 = vmatprep.subr.bf16.mxu0 %v4622_v21  ;;  %3447 = vmatprep.subr.bf16.mxu1 %v4637_v54  ;;  %v3344_v55 = vpack.c.bf16 %v489_v25, %v6289_v30  ;;  %v1180_v57 = vand.u32 4294901760, %v1179_v46  ;;  %v6087_v44 = vand.u32 4294901760, %v4768_v24 }
 0x107   :  { %v6086_v32 = vand.u32 4294901760, %v4760_v9  ;;  %v6079_v34 = vand.u32 4294901760, %v4779_v59  ;;  %v3450_v60 = vpack.c.bf16 %v1156_v3, %v1144_v28  ;;  %v3452_v11 = vpack.c.bf16 %v1162_v31, %v1150_v19 }
 0x108   :  { %v6290_v2 = vand.u32 4294901760, %v4751_v20  ;;  %v6085_v21 = vand.u32 4294901760, %v4792_v49  ;;  %v4818_v45 = vsub.f32 %v344_v51, %v1054_v37  ;;  %v4820_v54 = vsub.f32 %v342_v50, %v381_v33  ;;  %437 = vmatmul.mubr.f32.vlgmr.msra.gmra.mrb[0].mxu0 %v4419_v15  ;;  %1110 = vmatmul.mubr.f32.vlgmr.msra.gmra.mrb[0].mxu1 %v4419_v15 }
 0x109   :  { %v6291_v0 = vand.u32 4294901760, %v4757_v7  ;;  %v6084_v28 = vand.u32 4294901760, %v4802_v56  ;;  %v6292_v3 = vand.u32 4294901760, %v4762_v16  ;;  %3341 = vmatpush1.bf16.msra.mxu0 %v4624_v41  ;;  %3449 = vmatpush1.bf16.msra.mxu1 %v4639_v39  ;;  %v6293_v37 = vand.u32 4294901760, %v4332_v12 }
 0x10a   :  { %v530_v17 = vsub.f32 %v4751_v20, %v6290_v2  ;;  %v513_v50 = vand.u32 4294901760, %v512_v14  ;;  %3343 = vmatprep.subr.bf16.mxu0 %v4733_v36  ;;  %3451 = vmatprep.subr.bf16.mxu1 %v3450_v60  ;;  %v6294_v15 = vand.u32 4294901760, %v4345_v6  ;;  %v1186_v46 = vand.u32 4294901760, %v1185_v63 }
 0x10b   :  { %v1203_v25 = vsub.f32 %v4757_v7, %v6291_v0  ;;  %v536_v31 = vsub.f32 %v4762_v16, %v6292_v3  ;;  %v3346_v51 = vpack.c.bf16 %v507_v23, %v6293_v37  ;;  %v518_v2 = vsub.f32 %v4768_v24, %v6087_v44 }
 0x10c   :  { %v3454_v33 = vpack.c.bf16 %v1180_v57, %v6294_v15  ;;  %v1191_v41 = vsub.f32 %v4760_v9, %v6086_v32  ;;  %v1209_v12 = vsub.f32 %v4779_v59, %v6079_v34  ;;  %v4848_v39 = vsub.f32 %v4723_v1, %v383_v29  ;;  %v6329_v32 = vld [vmem:[#allocation81_spill] sm:$0xff]  ;;  %v6330_v44 = vld [vmem:[#allocation82_spill] sm:$0xff] }
 0x10d   :  { %v4850_v36 = vsub.f32 %v343_v40, %v1056_v27  ;;  %v6295_v6 = vmov 0.0   ;;  %v531_v63 = vand.u32 4294901760, %v530_v17  ;;  %v1204_v14 = vand.u32 4294901760, %v1203_v25  ;;  %3345 = vmatpush1.bf16.msra.mxu0 %v3344_v55  ;;  %3453 = vmatpush1.bf16.msra.mxu1 %v3452_v11 }
 0x10e   :  { %597 = vmatprep.mubr.f32.mxu0 %v6295_v6  ;;  %1270 = vmatprep.mubr.f32.mxu1 %v6295_v6  ;;  %v6083_v19 = vand.u32 4294901760, %v4820_v54  ;;  %v6082_v57 = vand.u32 4294901760, %v4818_v45  ;;  %v524_v60 = vsub.f32 %v4792_v49, %v6085_v21  ;;  %v1197_v1 = vsub.f32 %v4802_v56, %v6084_v28 }
 0x10f   :  { %3347 = vmatprep.subr.bf16.mxu0 %v3346_v51  ;;  %3455 = vmatprep.subr.bf16.mxu1 %v3454_v33  ;;  %v6296_v29 = vand.u32 4294901760, %v4319_v43  ;;  %v6297_v27 = vand.u32 4294901760, %v4350_v22  ;;  %v519_v30 = vand.u32 4294901760, %v518_v2  ;;  %v1192_v17 = vand.u32 4294901760, %v1191_v41 }
 0x110   :  { %v6081_v0 = vand.u32 4294901760, %v4848_v39  ;;  %v6080_v25 = vand.u32 4294901760, %v4850_v36  ;;  %v537_v3 = vand.u32 4294901760, %v536_v31  ;;  %v1210_v37 = vand.u32 4294901760, %v1209_v12 }
 0x111   :  { %v3348_v40 = vpack.c.bf16 %v513_v50, %v6296_v29  ;;  %v3456_v23 = vpack.c.bf16 %v1186_v46, %v6297_v27  ;;  %v3350_v15 = vpack.c.bf16 %v531_v63, %v519_v30  ;;  %v3458_v34 = vpack.c.bf16 %v1204_v14, %v1192_v17  ;;  %v6302_v30 = vld [vmem:[#allocation77_spill] sm:$0xff] }
 0x112   :  { %v542_v11 = vsub.f32 %v4820_v54, %v6083_v19  ;;  %v1215_v43 = vsub.f32 %v4818_v45, %v6082_v57  ;;  %v525_v22 = vand.u32 4294901760, %v524_v60  ;;  %v1198_v55 = vand.u32 4294901760, %v1197_v1  ;;  %v6298_v60 = vld [vmem:[#allocation62_spill] sm:$0xff]  ;;  %v6299_v1 = vld [vmem:[#allocation63_spill] sm:$0xff] }
 0x113   :  { %3349 = vmatpush1.bf16.msra.mxu0 %v3348_v40  ;;  %3457 = vmatpush1.bf16.msra.mxu1 %v3456_v23  ;;  %v548_v31 = vsub.f32 %v4848_v39, %v6081_v0  ;;  %v1221_v33 = vsub.f32 %v4850_v36, %v6080_v25  ;;  %v3462_v63 = vpack.c.bf16 %v4476_v62, %v4423_v18  ;;  %v6300_v40 = vld [vmem:[#allocation41_spill] sm:$0xff]  ;;  %v6301_v23 = vld [vmem:[#allocation71_spill] sm:$0xff]  ;;  %v6325_v25 = vand.u32 4294901760, %v4428_v61 }
 0x114   :  { %3351 = vmatprep.subr.bf16.mxu0 %v3350_v15  ;;  %3459 = vmatprep.subr.bf16.mxu1 %v3458_v34  ;;  %v3352_v51 = vpack.c.bf16 %v537_v3, %v525_v22  ;;  %v3460_v50 = vpack.c.bf16 %v1210_v37, %v1198_v55  ;;  %v543_v46 = vand.u32 4294901760, %v542_v11  ;;  %v1216_v2 = vand.u32 4294901760, %v1215_v43  ;;  %v6303_v3 = vld [vmem:[#allocation68_spill] sm:$0xff]  ;;  %v6305_v11 = vld [vmem:[#allocation69_spill] sm:$0xff] }
 0x115   :  { %v549_v41 = vand.u32 4294901760, %v548_v31  ;;  %v1222_v12 = vand.u32 4294901760, %v1221_v33  ;;  %v3354_v34 = vpack.c.bf16 %v4433_v8, %v4428_v61  ;;  %v3356_v14 = vpack.c.bf16 %v4452_v4, %v4388_v53  ;;  %v6304_v37 = vld [vmem:[#allocation72_spill] sm:$0xff]  ;;  %v6309_v33 = vld [vmem:[#allocation35_spill] sm:$0xff] }
 0x116   :  { %v3464_v29 = vpack.c.bf16 %v6299_v1, %v6298_v60  ;;  %v3358_v27 = vpack.c.bf16 %v4566_v47, %v4530_v13  ;;  %v3466_v17 = vpack.c.bf16 %v6302_v30, %v6301_v23  ;;  %v3360_v15 = vpack.c.bf16 %v6304_v37, %v6303_v3  ;;  %v6306_v43 = vld [vmem:[#allocation76_spill] sm:$0xff] }
 0x117   :  { %3353 = vmatpush1.bf16.msra.mxu0 %v3352_v51  ;;  %3461 = vmatpush1.bf16.msra.mxu1 %v3460_v50  ;;  %v3468_v22 = vpack.c.bf16 %v6306_v43, %v6305_v11  ;;  %v6307_v55 = vld [vmem:[#allocation40_spill] sm:$0xff]  ;;  %v6308_v50 = vld [vmem:[#allocation42_spill] sm:$0xff]  ;;  %v6326_v0 = vand.u32 4294901760, %v4433_v8  ;;  %v6327_v19 = vand.u32 4294901760, %v4423_v18  ;;  %v6328_v28 = vand.u32 4294901760, %v4476_v62  ;;  %v6335_v18 = vld [vmem:[#allocation47_spill] sm:$0xff] }
 0x118   :  { %544 = vmatprep.subr.mxu0 %v543_v46  ;;  %1217 = vmatprep.subr.mxu1 %v1216_v2  ;;  %v3362_v51 = vpack.c.bf16 %v4700_v5, %v6307_v55  ;;  %v3470_v31 = vpack.c.bf16 %v4709_v48, %v6308_v50  ;;  %v3364_v46 = vpack.c.bf16 %v4661_v10, %v6309_v33  ;;  %v6310_v2 = vld [vmem:[#allocation43_spill] sm:$0xff]  ;;  %v6333_v61 = vand.u32 4294901760, %v6298_v60 }
 0x119   :  { %v3390_v57 = vpack.c.bf16 %v6326_v0, %v6325_v25  ;;  %v3498_v21 = vpack.c.bf16 %v6328_v28, %v6327_v19  ;;  %v6334_v8 = vand.u32 4294901760, %v6299_v1  ;;  %v6336_v62 = vand.u32 4294901760, %v4530_v13 }
 0x11a   :  { %v6337_v28 = vand.u32 4294901760, %v4566_v47  ;;  %v6342_v60 = vand.u32 4294901760, %v6305_v11  ;;  %v6343_v13 = vand.u32 4294901760, %v6306_v43  ;;  %v6344_v1 = vand.u32 4294901760, %v6307_v55 }
 0x11b   :  { %550 = vmatpush1.msra.mxu0 %v549_v41  ;;  %1223 = vmatpush1.msra.mxu1 %v1222_v12  ;;  %v3472_v41 = vpack.c.bf16 %v4714_v35, %v6310_v2  ;;  %v3366_v12 = vpack.c.bf16 %v4751_v20, %v4768_v24  ;;  %v3500_v0 = vpack.c.bf16 %v6334_v8, %v6333_v61  ;;  %v6348_v11 = vand.u32 4294901760, %v6309_v33 }
 0x11c   :  { %3355 = vmatprep.subr.bf16.mxu0 %v3354_v34  ;;  %3463 = vmatprep.subr.bf16.mxu1 %v3462_v63  ;;  %v3474_v34 = vpack.c.bf16 %v4757_v7, %v4760_v9  ;;  %v3368_v63 = vpack.c.bf16 %v4762_v16, %v4792_v49  ;;  %v3394_v19 = vpack.c.bf16 %v6337_v28, %v6336_v62  ;;  %v6349_v43 = vand.u32 4294901760, %v4661_v10 }
 0x11d   :  { %599 = vmatmul.mubr.f32.vlgmr.msra.gmra.mrb[0].mxu0 %v6300_v40  ;;  %1272 = vmatmul.mubr.f32.vlgmr.msra.gmra.mrb[0].mxu1 %v6300_v40  ;;  %v3504_v47 = vpack.c.bf16 %v6343_v13, %v6342_v60  ;;  %v6350_v61 = vand.u32 4294901760, %v6310_v2  ;;  %v6351_v55 = vand.u32 4294901760, %v4714_v35  ;;  %v6352_v8 = vand.u32 4294901760, %v4768_v24  ;;  %v6369_v60 = vld [vmem:[#allocation25_spill] sm:$0xff] }
 0x11e   :  { %3357 = vmatpush1.bf16.msra.mxu0 %v3356_v14  ;;  %3465 = vmatpush1.bf16.msra.mxu1 %v3464_v29  ;;  %v3476_v14 = vpack.c.bf16 %v4779_v59, %v4802_v56  ;;  %v6311_v29 = vld [vmem:[#allocation45_spill] sm:$0xff]  ;;  %v6356_v10 = vand.u32 4294901760, %v4792_v49  ;;  %v6357_v33 = vand.u32 4294901760, %v4762_v16  ;;  %v6358_v2 = vand.u32 4294901760, %v4802_v56  ;;  %v6364_v16 = vld [vmem:[#allocation78_spill] sm:$0xff] }
 0x11f   :  { %3359 = vmatprep.subr.bf16.mxu0 %v3358_v27  ;;  %3467 = vmatprep.subr.bf16.mxu1 %v3466_v17  ;;  %v6312_v27 = vld [vmem:[#allocation48_spill] sm:$0xff]  ;;  %v6359_v24 = vand.u32 4294901760, %v4779_v59  ;;  %v6362_v28 = vand.u32 4294901760, %v4848_v39  ;;  %v6363_v49 = vand.u32 4294901760, %v4850_v36  ;;  %v6365_v59 = vld [vmem:[#allocation79_spill] sm:$0xff] }
 0x120   :  { %705 = vmatprep.mubr.f32.mxu0 %v6295_v6  ;;  %1378 = vmatprep.mubr.f32.mxu1 %v6295_v6  ;;  %v6313_v17 = vld [vmem:[#allocation44_spill] sm:$0xff]  ;;  %v3404_v35 = vpack.c.bf16 %v6357_v33, %v6356_v10 }
 0x121   :  { %v6377_v10 = vld [vmem:[#allocation24_spill] sm:$0xff] }
 0x122   :  { %3361 = vmatpush1.bf16.msra.mxu0 %v3360_v15  ;;  %3469 = vmatpush1.bf16.msra.mxu1 %v3468_v22  ;;  %v6314_v15 = vld [vmem:[#allocation46_spill] sm:$0xff]  ;;  %v6315_v22 = vld [vmem:[#allocation49_spill] sm:$0xff] }
 0x123   :  { %3363 = vmatprep.subr.bf16.mxu0 %v3362_v51  ;;  %3471 = vmatprep.subr.bf16.mxu1 %v3470_v31  ;;  %v6316_v51 = vld [vmem:[#allocation64_spill] sm:$0xff]  ;;  %v6317_v31 = vld [vmem:[#allocation66_spill] sm:$0xff] }
 0x126   :  { %3365 = vmatpush1.bf16.msra.mxu0 %v3364_v46  ;;  %3473 = vmatpush1.bf16.msra.mxu1 %v3472_v41  ;;  %v6318_v46 = vld [vmem:[#allocation65_spill] sm:$0xff]  ;;  %v6319_v41 = vld [vmem:[#allocation67_spill] sm:$0xff] }
 0x127   :  { %3367 = vmatprep.subr.bf16.mxu0 %v3366_v12  ;;  %3475 = vmatprep.subr.bf16.mxu1 %v3474_v34  ;;  %v6320_v12 = vld [vmem:[#allocation73_spill] sm:$0xff]  ;;  %v6321_v34 = vld [vmem:[#allocation70_spill] sm:$0xff] }
 0x12a   :  { %3369 = vmatpush1.bf16.msra.mxu0 %v3368_v63  ;;  %3477 = vmatpush1.bf16.msra.mxu1 %v3476_v14  ;;  %v6322_v63 = vld [vmem:[#allocation75_spill] sm:$0xff]  ;;  %v6323_v14 = vld [vmem:[#allocation74_spill] sm:$0xff] }
 0x12b   :  { %655 = vmatprep.subr.mxu0 %v4820_v54  ;;  %1328 = vmatprep.subr.mxu1 %v4818_v45 }
 0x12e   :  { %658 = vmatpush1.msra.mxu0 %v4848_v39  ;;  %1331 = vmatpush1.msra.mxu1 %v4850_v36 }
 0x12f   :  { %3371 = vmatprep.subr.bf16.mxu0 %v6311_v29  ;;  %3479 = vmatprep.subr.bf16.mxu1 %v6312_v27 }
 0x130   :  { %708 = vmatmul.mubr.f32.vlgmr.msra.gmra.mrb[0].mxu0 %v6313_v17  ;;  %1381 = vmatmul.mubr.f32.vlgmr.msra.gmra.mrb[0].mxu1 %v6313_v17  ;;  %v6324_v17 = vld [vmem:[#allocation80_spill] sm:$0xff] }
 0x131   :  { %3373 = vmatpush1.bf16.msra.mxu0 %v6314_v15  ;;  %3481 = vmatpush1.bf16.msra.mxu1 %v6315_v22 }
 0x132   :  { %3375 = vmatprep.subr.bf16.mxu0 %v6316_v51  ;;  %3483 = vmatprep.subr.bf16.mxu1 %v6317_v31 }
 0x133   :  { %796 = vmatprep.mubr.f32.mxu0 %v6295_v6  ;;  %1469 = vmatprep.mubr.f32.mxu1 %v6295_v6 }
 0x135   :  { %3377 = vmatpush1.bf16.msra.mxu0 %v6318_v46  ;;  %3485 = vmatpush1.bf16.msra.mxu1 %v6319_v41 }
 0x136   :  { %3379 = vmatprep.subr.bf16.mxu0 %v6320_v12  ;;  %3487 = vmatprep.subr.bf16.mxu1 %v6321_v34 }
 0x139   :  { %3381 = vmatpush1.bf16.msra.mxu0 %v6322_v63  ;;  %3489 = vmatpush1.bf16.msra.mxu1 %v6323_v14 }
 0x13a   :  { %3383 = vmatprep.subr.bf16.mxu0 %v4725_v38  ;;  %3491 = vmatprep.subr.bf16.mxu1 %v4727_v58 }
 0x13d   :  { %3385 = vmatpush1.bf16.msra.mxu0 %v4731_v42  ;;  %3493 = vmatpush1.bf16.msra.mxu1 %v4729_v26 }
 0x13e   :  { %3387 = vmatprep.subr.bf16.mxu0 %v4771_v52  ;;  %3495 = vmatprep.subr.bf16.mxu1 %v6324_v17  ;;  %v6331_v52 = vand.u32 4294901760, %v4388_v53  ;;  %v6332_v17 = vand.u32 4294901760, %v4452_v4  ;;  %v6339_v53 = vand.u32 4294901760, %v6302_v30  ;;  %v6346_v30 = vand.u32 4294901760, %v6308_v50 }
 0x13f   :  { %v6353_v50 = vand.u32 4294901760, %v4751_v20  ;;  %v3512_v20 = vpack.c.bf16 %v6359_v24, %v6358_v2  ;;  %v6379_v24 = vld [vmem:[#allocation23_spill] sm:$0xff] }
 0x140   :  { %v3392_v26 = vpack.c.bf16 %v6332_v17, %v6331_v52  ;;  %v6340_v52 = vand.u32 4294901760, %v6303_v3  ;;  %v6347_v3 = vand.u32 4294901760, %v4709_v48  ;;  %v3400_v17 = vpack.c.bf16 %v6349_v43, %v6348_v11  ;;  %v6374_v43 = vld [vmem:[#allocation19_spill] sm:$0xff] }
 0x141   :  { %3389 = vmatpush1.bf16.msra.mxu0 %v6329_v32  ;;  %3497 = vmatpush1.bf16.msra.mxu1 %v6330_v44  ;;  %v3402_v48 = vpack.c.bf16 %v6353_v50, %v6352_v8  ;;  %v6375_v8 = vld [vmem:[#allocation20_spill] sm:$0xff] }
 0x142   :  { %3391 = vmatprep.subr.bf16.mxu0 %v3390_v57  ;;  %3499 = vmatprep.subr.bf16.mxu1 %v3498_v21  ;;  %v6338_v21 = vand.u32 4294901760, %v6301_v23  ;;  %v6341_v57 = vand.u32 4294901760, %v6304_v37  ;;  %v3506_v37 = vpack.c.bf16 %v6347_v3, %v6346_v30 }
 0x144   :  { %800 = vmatmul.mubr.f32.vlgmr.msra.gmra.mrb[0].mxu0 %v6335_v18  ;;  %1473 = vmatmul.mubr.f32.vlgmr.msra.gmra.mrb[0].mxu1 %v6335_v18  ;;  %v3502_v4 = vpack.c.bf16 %v6339_v53, %v6338_v21  ;;  %v3396_v25 = vpack.c.bf16 %v6341_v57, %v6340_v52  ;;  %v6355_v18 = vand.u32 4294901760, %v4757_v7  ;;  %v6361_v7 = vand.u32 4294901760, %v4818_v45  ;;  %v6366_v45 = vld [vmem:[#allocation80_spill] sm:$0xff] }
 0x145   :  { %3393 = vmatpush1.bf16.msra.mxu0 %v3392_v26  ;;  %3501 = vmatpush1.bf16.msra.mxu1 %v3500_v0  ;;  %v6345_v26 = vand.u32 4294901760, %v4700_v5  ;;  %v3508_v5 = vpack.c.bf16 %v6351_v55, %v6350_v61  ;;  %v6354_v0 = vand.u32 4294901760, %v4760_v9  ;;  %v6360_v9 = vand.u32 4294901760, %v4820_v54 }
 0x146   :  { %3395 = vmatprep.subr.bf16.mxu0 %v3394_v19  ;;  %3503 = vmatprep.subr.bf16.mxu1 %v3502_v4 }
 0x147   :  { %924 = vmatprep.mubr.f32.mxu0 %v6295_v6  ;;  %1597 = vmatprep.mubr.f32.mxu1 %v6295_v6  ;;  %v3398_v23 = vpack.c.bf16 %v6345_v26, %v6344_v1  ;;  %v3510_v62 = vpack.c.bf16 %v6355_v18, %v6354_v0 }
 0x149   :  { %3397 = vmatpush1.bf16.msra.mxu0 %v3396_v25  ;;  %3505 = vmatpush1.bf16.msra.mxu1 %v3504_v47 }
 0x14a   :  { %3399 = vmatprep.subr.bf16.mxu0 %v3398_v23  ;;  %3507 = vmatprep.subr.bf16.mxu1 %v3506_v37 }
 0x14d   :  { %3401 = vmatpush1.bf16.msra.mxu0 %v3400_v17  ;;  %3509 = vmatpush1.bf16.msra.mxu1 %v3508_v5 }
 0x14e   :  { %3403 = vmatprep.subr.bf16.mxu0 %v3402_v48  ;;  %3511 = vmatprep.subr.bf16.mxu1 %v3510_v62  ;;  %v6376_v48 = vld [vmem:[#allocation26_spill] sm:$0xff] }
 0x151   :  { %3405 = vmatpush1.bf16.msra.mxu0 %v3404_v35  ;;  %3513 = vmatpush1.bf16.msra.mxu1 %v3512_v20  ;;  %v6378_v35 = vld [vmem:[#allocation22_spill] sm:$0xff] }
 0x152   :  { %873 = vmatprep.subr.mxu0 %v6360_v9  ;;  %1546 = vmatprep.subr.mxu1 %v6361_v7 }
 0x155   :  { %877 = vmatpush1.msra.mxu0 %v6362_v28  ;;  %1550 = vmatpush1.msra.mxu1 %v6363_v49 }
 0x156   :  { %3407 = vmatprep.subr.bf16.mxu0 %v6311_v29  ;;  %3515 = vmatprep.subr.bf16.mxu1 %v6312_v27 }
 0x157   :  { %926 = vmatmul.mubr.f32.vlgmr.msra.gmra.mrb[0].mxu0 %v6300_v40  ;;  %1599 = vmatmul.mubr.f32.vlgmr.msra.gmra.mrb[0].mxu1 %v6300_v40 }
 0x158   :  { %3409 = vmatpush1.bf16.msra.mxu0 %v6314_v15  ;;  %3517 = vmatpush1.bf16.msra.mxu1 %v6315_v22  ;;  %v6461_v15 = vld [vmem:[#allocation59_spill] sm:$0xff] }
 0x159   :  { %3411 = vmatprep.subr.bf16.mxu0 %v6316_v51  ;;  %3519 = vmatprep.subr.bf16.mxu1 %v6317_v31  ;;  %v1699_v51 = vld [vmem:[#allocation8] sm:$0xff]  ;;  %v1700_v31 = vld [vmem:[#allocation8 + $0x8] sm:$0xff] }
 0x15a   :  { %1014 = vmatprep.mubr.f32.mxu0 %v6295_v6  ;;  %1687 = vmatprep.mubr.f32.mxu1 %v6295_v6  ;;  %v1830_v21 = vsel %vm345_vm2, %v1699_v51, 0  ;;  %v1833_v53 = vsel %vm345_vm2, %v1700_v31, 0 }
 0x15b   :  { %v5155_v3 = vand.u32 4294901760, %v1830_v21  ;;  %v5157_v37 = vand.u32 4294901760, %v1833_v53 }
 0x15c   :  { %3413 = vmatpush1.bf16.msra.mxu0 %v6318_v46  ;;  %3521 = vmatpush1.bf16.msra.mxu1 %v6319_v41 }
 0x15d   :  { %3415 = vmatprep.subr.bf16.mxu0 %v6320_v12  ;;  %3523 = vmatprep.subr.bf16.mxu1 %v6321_v34  ;;  %6373 = vst [vmem:[#allocation71_spill] sm:$0xff] %v5157_v37 }
 0x160   :  { %3417 = vmatpush1.bf16.msra.mxu0 %v6322_v63  ;;  %3525 = vmatpush1.bf16.msra.mxu1 %v6323_v14  ;;  %v6368_v63 = vld [vmem:[#allocation21_spill] sm:$0xff] }
 0x161   :  { %3419 = vmatprep.subr.bf16.mxu0 %v4725_v38  ;;  %3527 = vmatprep.subr.bf16.mxu1 %v4727_v58 }
 0x164   :  { %3421 = vmatpush1.bf16.msra.mxu0 %v4731_v42  ;;  %3529 = vmatpush1.bf16.msra.mxu1 %v6364_v16 }
 0x165   :  { %3423 = vmatprep.subr.bf16.mxu0 %v6365_v59  ;;  %3531 = vmatprep.subr.bf16.mxu1 %v6366_v45 }
 0x168   :  { %3425 = vmatpush1.bf16.msra.mxu0 %v6329_v32  ;;  %3533 = vmatpush1.bf16.msra.mxu1 %v6330_v44 }
 0x16b   :  { %1016 = vmatmul.mubr.f32.vlgmr.msra.gmra.mrb[0].mxu0 %v6300_v40  ;;  %1689 = vmatmul.mubr.f32.vlgmr.msra.gmra.mrb[0].mxu1 %v6300_v40 }
 0x16c   :  { %1917 = vmatprep.mubr.f32.mxu0 %v6295_v6  ;;  %2639 = vmatprep.mubr.f32.mxu1 %v6295_v6 }
 0x23e   :  { %v1017_v38 = vpop.f32.mrb[0].mxu0  ;;  %v1690_v58 = vpop.f32.mrb[0].mxu1 }
 0x23f   :  { %v5048_v42 = vmax.f32 %v1017_v38, 0.0  ;;  %v1019_v56 = vpop.f32.mrb[1].mxu0  ;;  %v1692_v54 = vpop.f32.mrb[1].mxu1  ;;  %v5056_v44 = vmax.f32 %v1690_v58, 0.0 }
 0x240   :  { %v5050_v39 = vmax.f32 %v1019_v56, 0.0  ;;  %v5058_v32 = vmax.f32 %v1692_v54, 0.0 }
 0x241   :  { %1701 = vrot.lane.b32.xlu0 %v5048_v42, %s3976_s1  ;;  %v6098_v46 = vand.u32 4294901760, %v5048_v42  ;;  %v6097_v41 = vand.u32 4294901760, %v5056_v44 }
 0x242   :  { %1703 = vrot.lane.b32.xlu1 %v5050_v39, %s3976_s1  ;;  %v6101_v34 = vand.u32 4294901760, %v5050_v39  ;;  %v6096_v57 = vand.u32 4294901760, %v5058_v32 }
 0x243   :  { %v5141_v47 = vsub.f32 %v5048_v42, %v6098_v46  ;;  %v5146_v1 = vsub.f32 %v5056_v44, %v6097_v41 }
 0x244   :  { %v5153_v30 = vsub.f32 %v5050_v39, %v6101_v34  ;;  %v5181_v9 = vsub.f32 %v5058_v32, %v6096_v57  ;;  %v6405_v34 = vld [vmem:[#allocation39_spill] sm:$0xff] }
 0x245   :  { %1705 = vrot.lane.b32.xlu0 %v5056_v44, %s3976_s1  ;;  %6370 = vst [vmem:[#allocation62_spill] sm:$0xff] %v5141_v47  ;;  %6371 = vst [vmem:[#allocation63_spill] sm:$0xff] %v5146_v1  ;;  %v6091_v16 = vand.u32 4294901760, %v5141_v47  ;;  %v6090_v59 = vand.u32 4294901760, %v5146_v1 }
 0x246   :  { %1707 = vrot.lane.b32.xlu1 %v5058_v32, %s3976_s1  ;;  %6372 = vst [vmem:[#allocation41_spill] sm:$0xff] %v5153_v30  ;;  %6380 = vst [vmem:[#allocation77_spill] sm:$0xff] %v5181_v9  ;;  %v6093_v49 = vand.u32 4294901760, %v5153_v30 }
 0x249   :  { %1717 = vrot.lane.b32.xlu0 %v5048_v42, %s3977_s3 }
 0x24a   :  { %1719 = vrot.lane.b32.xlu1 %v5050_v39, %s3977_s3 }
 0x24d   :  { %1721 = vrot.lane.b32.xlu0 %v5056_v44, %s3977_s3 }
 0x24e   :  { %1723 = vrot.lane.b32.xlu1 %v5058_v32, %s3977_s3 }
 0x251   :  { %1733 = vrot.lane.b32.xlu0 %v5048_v42, %s3978_s15 }
 0x252   :  { %1735 = vrot.lane.b32.xlu1 %v5050_v39, %s3978_s15 }
 0x255   :  { %1737 = vrot.lane.b32.xlu0 %v5056_v44, %s3978_s15 }
 0x256   :  { %1739 = vrot.lane.b32.xlu1 %v5058_v32, %s3978_s15 }
 0x259   :  { %1749 = vrot.lane.b32.xlu0 %v5048_v42, %s3979_s16 }
 0x25a   :  { %1751 = vrot.lane.b32.xlu1 %v5050_v39, %s3979_s16 }
 0x25d   :  { %1753 = vrot.lane.b32.xlu0 %v5056_v44, %s3979_s16 }
 0x25e   :  { %1755 = vrot.lane.b32.xlu1 %v5058_v32, %s3979_s16 }
 0x261   :  { %1765 = vrot.lane.b32.xlu0 %v5048_v42, %s3980_s17 }
 0x262   :  { %1767 = vrot.lane.b32.xlu1 %v5050_v39, %s3980_s17 }
 0x265   :  { %1769 = vrot.lane.b32.xlu0 %v5056_v44, %s3980_s17 }
 0x266   :  { %1771 = vrot.lane.b32.xlu1 %v5058_v32, %s3980_s17 }
 0x269   :  { %1781 = vrot.lane.b32.xlu0 %v5048_v42, %s3981_s18 }
 0x26a   :  { %1783 = vrot.lane.b32.xlu1 %v5050_v39, %s3981_s18 }
 0x26d   :  { %1785 = vrot.lane.b32.xlu0 %v5056_v44, %s3981_s18 }
 0x26e   :  { %1787 = vrot.lane.b32.xlu1 %v5058_v32, %s3981_s18 }
 0x271   :  { %1797 = vrot.lane.b32.xlu0 %v5048_v42, %s3982_s19 }
 0x272   :  { %1799 = vrot.lane.b32.xlu1 %v5050_v39, %s3982_s19 }
 0x275   :  { %1801 = vrot.lane.b32.xlu0 %v5056_v44, %s3982_s19 }
 0x276   :  { %1803 = vrot.lane.b32.xlu1 %v5058_v32, %s3982_s19 }
 0x279   :  { %1813 = vrot.lane.b32.xlu0 %v5048_v42, %s3983_s20 }
 0x27a   :  { %1815 = vrot.lane.b32.xlu1 %v5050_v39, %s3983_s20 }
 0x27d   :  { %1817 = vrot.lane.b32.xlu0 %v5056_v44, %s3983_s20 }
 0x27e   :  { %1819 = vrot.lane.b32.xlu1 %v5058_v32, %s3983_s20 }
 0x2b3   :  { %v1702_v36 = vpop.permute.xlu0 %1701 }
 0x2b4   :  { %v1704_v40 = vpop.permute.xlu1 %1703 }
 0x2b5   :  { %v1711_v22 = vsel %vm89_vm0, %v1702_v36, %v1704_v40 }
 0x2b6   :  { %v1714_v14 = vmul.f32 %v1711_v22, %v6368_v63 }
 0x2b7   :  { %v1706_v29 = vpop.permute.xlu0 %1705 }
 0x2b8   :  { %v1708_v27 = vpop.permute.xlu1 %1707  ;;  %v1710_v26 = vsel %vm89_vm0, %v1704_v40, %v1706_v29  ;;  %v1835_v11 = vand.u32 4294901760, %v1714_v14  ;;  %v5193_v40 = vsub.f32 %v1830_v21, %v5155_v3  ;;  %v5209_v21 = vsub.f32 %v5153_v30, %v6093_v49 }
 0x2b9   :  { %v1712_v4 = vsel %vm89_vm0, %v1708_v27, %v1702_v36  ;;  %v1709_v25 = vsel %vm89_vm0, %v1706_v29, %v1708_v27  ;;  %v1715_v33 = vmul.f32 %v1710_v26, %v6377_v10  ;;  %v5196_v29 = vsub.f32 %v1833_v53, %v5157_v37  ;;  %v6453_v37 = vld [vmem:[#allocation58_spill] sm:$0xff] }
 0x2ba   :  { %v1713_v17 = vmul.f32 %v1712_v4, %v6374_v43  ;;  %v1716_v50 = vmul.f32 %v1709_v25, %v6375_v8  ;;  %6382 = vst [vmem:[#allocation72_spill] sm:$0xff] %v5193_v40  ;;  %v5214_v53 = vsub.f32 %v5141_v47, %v6091_v16  ;;  %v5219_v4 = vsub.f32 %v5146_v1, %v6090_v59 }
 0x2bb   :  { %v1718_v12 = vpop.permute.xlu0 %1717  ;;  %6383 = vst [vmem:[#allocation69_spill] sm:$0xff] %v5196_v29  ;;  %v2559_v27 = vand.u32 4294901760, %v1715_v33  ;;  %v5225_v25 = vand.u32 4294901760, %v5193_v40  ;;  %v5230_v26 = vsub.f32 %v1714_v14, %v1835_v11 }
 0x2bc   :  { %v1720_v19 = vpop.permute.xlu1 %1719  ;;  %v1837_v45 = vand.u32 4294901760, %v1713_v17  ;;  %v2557_v36 = vand.u32 4294901760, %v1716_v50 }
 0x2bd   :  { %v1727_v52 = vsel %vm122_vm1, %v1718_v12, %v1720_v19  ;;  %6387 = vst [vmem:[#allocation35_spill] sm:$0xff] %v5225_v25  ;;  %v6095_v16 = vand.u32 4294901760, %v5230_v26 }
 0x2be   :  { %v5136_v13 = vmul.f32 %v1727_v52, %v6369_v60  ;;  %v5228_v60 = vand.u32 4294901760, %v5196_v29 }
 0x2bf   :  { %v1722_v23 = vpop.permute.xlu0 %1721 }
 0x2c0   :  { %v1839_v61 = vand.u32 4294901760, %v5136_v13  ;;  %v1726_v55 = vsel %vm122_vm1, %v1720_v19, %v1722_v23  ;;  %v1724_v5 = vpop.permute.xlu1 %1723  ;;  %6388 = vst [vmem:[#allocation43_spill] sm:$0xff] %v5228_v60 }
 0x2c1   :  { %v5165_v0 = vmul.f32 %v1726_v55, %v6376_v48  ;;  %v1725_v18 = vsel %vm122_vm1, %v1722_v23, %v1724_v5  ;;  %v1728_v62 = vsel %vm122_vm1, %v1724_v5, %v1718_v12  ;;  %v6092_v12 = vand.u32 4294901760, %v5181_v9  ;;  %v6389_v55 = vld [vmem:[#allocation27_spill] sm:$0xff] }
 0x2c2   :  { %v5173_v2 = vmul.f32 %v1728_v62, %v6378_v35  ;;  %v5176_v20 = vmul.f32 %v1725_v18, %v6379_v24  ;;  %v5183_v28 = vpack.c.bf16 %v1839_v61, %v1835_v11  ;;  %v5250_v24 = vsub.f32 %v1715_v33, %v2559_v27  ;;  %v6392_v18 = vld [vmem:[#allocation28_spill] sm:$0xff]  ;;  %v6397_v35 = vld [vmem:[#allocation34_spill] sm:$0xff] }
 0x2c3   :  { %v1734_v7 = vpop.permute.xlu0 %1733  ;;  %v2563_v38 = vand.u32 4294901760, %v5165_v0  ;;  %v5236_v43 = vsub.f32 %v5181_v9, %v6092_v12  ;;  %v5260_v12 = vsub.f32 %v1716_v50, %v2557_v36  ;;  %v5263_v49 = vsub.f32 %v5136_v13, %v1839_v61  ;;  %v6394_v50 = vld [vmem:[#allocation33_spill] sm:$0xff] }
 0x2c4   :  { %6381 = vst [vmem:[#allocation68_spill] sm:$0xff] %v5183_v28  ;;  %v1841_v58 = vand.u32 4294901760, %v5173_v2  ;;  %v2561_v56 = vand.u32 4294901760, %v5176_v20  ;;  %v1736_v54 = vpop.permute.xlu1 %1735  ;;  %3535 = vmatprep.subr.bf16.mxu0 %v5183_v28  ;;  %6390 = vst [vmem:[#allocation45_spill] sm:$0xff] %v5250_v24 }
 0x2c5   :  { %v5203_v63 = vpack.c.bf16 %v2563_v38, %v2559_v27  ;;  %v1743_v52 = vsel %vm155_vm3, %v1734_v7, %v1736_v54 }
 0x2c6   :  { %v5198_v22 = vpack.c.bf16 %v1841_v58, %v1837_v45  ;;  %v5200_v31 = vpack.c.bf16 %v2561_v56, %v2557_v36  ;;  %v1746_v5 = vmul.f32 %v1743_v52, %v6389_v55  ;;  %v6391_v55 = vld [vmem:[#allocation31_spill] sm:$0xff] }
 0x2c7   :  { %v1738_v51 = vpop.permute.xlu0 %1737  ;;  %6386 = vst [vmem:[#allocation42_spill] sm:$0xff] %v5203_v63 }
 0x2c8   :  { %6384 = vst [vmem:[#allocation76_spill] sm:$0xff] %v5198_v22  ;;  %6385 = vst [vmem:[#allocation40_spill] sm:$0xff] %v5200_v31  ;;  %3537 = vmatpush1.bf16.msra.mxu0 %v5198_v22  ;;  %v1740_v19 = vpop.permute.xlu1 %1739  ;;  %3643 = vmatprep.subr.bf16.mxu1 %v5200_v31  ;;  %v1742_v62 = vsel %vm155_vm3, %v1736_v54, %v1738_v51  ;;  %v1843_v27 = vand.u32 4294901760, %v1746_v5  ;;  %v5282_v54 = vsub.f32 %v5173_v2, %v1841_v58  ;;  %v6444_v22 = vld [vmem:[#allocation56_spill] sm:$0xff] }
 0x2c9   :  { %3645 = vmatpush1.bf16.msra.mxu1 %v5203_v63  ;;  %v1744_v14 = vsel %vm155_vm3, %v1740_v19, %v1734_v7  ;;  %v1741_v52 = vsel %vm155_vm3, %v1738_v51, %v1740_v19  ;;  %v5258_v7 = vsub.f32 %v1713_v17, %v1837_v45  ;;  %v6393_v17 = vld [vmem:[#allocation30_spill] sm:$0xff]  ;;  %v6395_v51 = vld [vmem:[#allocation29_spill] sm:$0xff]  ;;  %v6416_v63 = vand.u32 4294901760, %v5260_v12 }
 0x2ca   :  { %v1745_v48 = vmul.f32 %v1744_v14, %v6392_v18  ;;  %v5272_v45 = vmul.f32 %v1741_v52, %v6393_v17  ;;  %v1747_v18 = vmul.f32 %v1742_v62, %v6395_v51  ;;  %v6396_v14 = vld [vmem:[#allocation32_spill] sm:$0xff]  ;;  %v5293_v17 = vsub.f32 %v5165_v0, %v2563_v38 }
 0x2cb   :  { %v1750_v23 = vpop.permute.xlu0 %1749 }
 0x2cc   :  { %v1752_v8 = vpop.permute.xlu1 %1751  ;;  %6398 = vst [vmem:[#allocation48_spill] sm:$0xff] %v5293_v17  ;;  %v1845_v58 = vand.u32 4294901760, %v1745_v48 }
 0x2cd   :  { %v1759_v11 = vsel %vm188_vm4, %v1750_v23, %v1752_v8 }
 0x2ce   :  { %v5255_v59 = vmul.f32 %v1759_v11, %v6391_v55 }
 0x2cf   :  { %v1754_v33 = vpop.permute.xlu0 %1753 }
 0x2d0   :  { %v6094_v19 = vand.u32 4294901760, %v5255_v59  ;;  %v1758_v11 = vsel %vm188_vm4, %v1752_v8, %v1754_v33  ;;  %v1756_v55 = vpop.permute.xlu1 %1755 }
 0x2d1   :  { %v5275_v36 = vmul.f32 %v1758_v11, %v6394_v50  ;;  %v1757_v13 = vsel %vm188_vm4, %v1754_v33, %v1756_v55  ;;  %v1760_v61 = vsel %vm188_vm4, %v1756_v55, %v1750_v23  ;;  %v6100_v11 = vand.u32 4294901760, %v5250_v24 }
 0x2d2   :  { %v5286_v8 = vmul.f32 %v1760_v61, %v6396_v14  ;;  %v5289_v52 = vmul.f32 %v1757_v13, %v6397_v35  ;;  %v5296_v33 = vsub.f32 %v5176_v20, %v2561_v56  ;;  %v5300_v2 = vpack.c.bf16 %v6094_v19, %v1843_v27  ;;  %v6401_v14 = vld [vmem:[#allocation36_spill] sm:$0xff] }
 0x2d3   :  { %v1766_v23 = vpop.permute.xlu0 %1765  ;;  %v6103_v62 = vand.u32 4294901760, %v5275_v36  ;;  %v2565_v13 = vand.u32 4294901760, %v5272_v45  ;;  %v5312_v20 = vsub.f32 %v5230_v26, %v6095_v16  ;;  %v6106_v56 = vand.u32 4294901760, %v5282_v54 }
 0x2d4   :  { %6399 = vst [vmem:[#allocation44_spill] sm:$0xff] %v5300_v2  ;;  %v6099_v55 = vand.u32 4294901760, %v5286_v8  ;;  %v6102_v35 = vand.u32 4294901760, %v5289_v52  ;;  %v1768_v50 = vpop.permute.xlu1 %1767  ;;  %3539 = vmatprep.subr.bf16.mxu0 %v5300_v2  ;;  %v2567_v61 = vand.u32 4294901760, %v1747_v18  ;;  %v5326_v10 = vsub.f32 %v5250_v24, %v6100_v11 }
 0x2d5   :  { %v1775_v0 = vsel %vm221_vm5, %v1766_v23, %v1768_v50  ;;  %v5343_v16 = vsub.f32 %v1746_v5, %v1843_v27  ;;  %v6406_v27 = vand.u32 4294901760, %v5263_v49 }
 0x2d6   :  { %v5318_v51 = vpack.c.bf16 %v6099_v55, %v1845_v58  ;;  %v5321_v19 = vmul.f32 %v1775_v0, %v6401_v14  ;;  %v5331_v41 = vpack.c.bf16 %v6102_v35, %v2565_v13  ;;  %v5337_v0 = vpack.c.bf16 %v6103_v62, %v2567_v61  ;;  %v6404_v35 = vld [vmem:[#allocation38_spill] sm:$0xff] }
 0x2d7   :  { %v1770_v57 = vpop.permute.xlu0 %1769 }
 0x2d8   :  { %6400 = vst [vmem:[#allocation46_spill] sm:$0xff] %v5318_v51  ;;  %6402 = vst [vmem:[#allocation49_spill] sm:$0xff] %v5331_v41  ;;  %v1774_v14 = vsel %vm221_vm5, %v1768_v50, %v1770_v57  ;;  %3541 = vmatpush1.bf16.msra.mxu0 %v5318_v51  ;;  %v1772_v11 = vpop.permute.xlu1 %1771  ;;  %3647 = vmatprep.subr.bf16.mxu1 %v5331_v41  ;;  %v1961_v50 = vsub.f32 %v5282_v54, %v6106_v56  ;;  %v6409_v56 = vand.u32 4294901760, %v5296_v33 }
 0x2d9   :  { %6403 = vst [vmem:[#allocation64_spill] sm:$0xff] %v5337_v0  ;;  %v5346_v38 = vmul.f32 %v1774_v14, %v6404_v35  ;;  %v1773_v55 = vsel %vm221_vm5, %v1770_v57, %v1772_v11  ;;  %v1776_v62 = vsel %vm221_vm5, %v1772_v11, %v1766_v23  ;;  %3649 = vmatpush1.bf16.msra.mxu1 %v5337_v0  ;;  %v6408_v11 = vld [vmem:[#allocation37_spill] sm:$0xff]  ;;  %v6411_v0 = vand.u32 4294901760, %v5293_v17 }
 0x2da   :  { %v5358_v5 = vmul.f32 %v1773_v55, %v6405_v34  ;;  %v1955_v35 = vsub.f32 %v5263_v49, %v6406_v27  ;;  %v5364_v14 = vsub.f32 %v1745_v48, %v1845_v58  ;;  %v5368_v23 = vmul.f32 %v1776_v62, %v6408_v11 }
 0x2db   :  { %v1782_v51 = vpop.permute.xlu0 %1781  ;;  %v2677_v46 = vsub.f32 %v5296_v33, %v6409_v56  ;;  %v6410_v34 = vand.u32 4294901760, %v5258_v7  ;;  %v2683_v27 = vsub.f32 %v5293_v17, %v6411_v0  ;;  %v5379_v48 = vsub.f32 %v1747_v18, %v2567_v61 }
 0x2dc   :  { %6407 = vst [vmem:[#allocation66_spill] sm:$0xff] %v5364_v14  ;;  %v6117_v58 = vand.u32 4294901760, %v5358_v5  ;;  %v1784_v57 = vpop.permute.xlu1 %1783  ;;  %v6413_v11 = vand.u32 4294901760, %v5050_v39  ;;  %v6414_v41 = vand.u32 4294901760, %v5346_v38  ;;  %v6417_v18 = vand.u32 4294901760, %v5048_v42 }
 0x2dd   :  { %v1949_v55 = vsub.f32 %v5258_v7, %v6410_v34  ;;  %6412 = vst [vmem:[#allocation65_spill] sm:$0xff] %v5379_v48  ;;  %v2665_v34 = vsub.f32 %v5260_v12, %v6416_v63  ;;  %v6418_v61 = vand.u32 4294901760, %v5321_v19  ;;  %v6420_v62 = vand.u32 4294901760, %v5056_v44 }
 0x2de   :  { %v5387_v56 = vpack.c.bf16 %v6414_v41, %v6413_v11  ;;  %v1956_v41 = vand.u32 4294901760, %v1955_v35  ;;  %v1962_v11 = vand.u32 4294901760, %v1961_v50  ;;  %v5407_v63 = vsub.f32 %v5272_v45, %v2565_v13 }
 0x2df   :  { %v5397_v0 = vpack.c.bf16 %v6418_v61, %v6417_v18  ;;  %v5403_v39 = vpack.c.bf16 %v6117_v58, %v6420_v62  ;;  %v1786_v31 = vpop.permute.xlu0 %1785  ;;  %v6423_v42 = vand.u32 4294901760, %v5058_v32  ;;  %v6424_v18 = vand.u32 4294901760, %v5368_v23 }
 0x2e0   :  { %6415 = vst [vmem:[#allocation67_spill] sm:$0xff] %v5387_v56  ;;  %6422 = vst [vmem:[#allocation75_spill] sm:$0xff] %v5407_v63  ;;  %3543 = vmatprep.subr.bf16.mxu0 %v5387_v56  ;;  %v2678_v44 = vand.u32 4294901760, %v2677_v46  ;;  %v1788_v58 = vpop.permute.xlu1 %1787  ;;  %v1944_v50 = vand.u32 4294901760, %v5312_v20  ;;  %v2684_v35 = vand.u32 4294901760, %v2683_v27  ;;  %v2666_v13 = vand.u32 4294901760, %v2665_v34 }
 0x2e1   :  { %6419 = vst [vmem:[#allocation73_spill] sm:$0xff] %v5397_v0  ;;  %6421 = vst [vmem:[#allocation70_spill] sm:$0xff] %v5403_v39  ;;  %v5414_v61 = vpack.c.bf16 %v6424_v18, %v6423_v42  ;;  %3545 = vmatpush1.bf16.msra.mxu0 %v5397_v0  ;;  %v6426_v32 = vsub.f32 %v5193_v40, %v5225_v25  ;;  %v1950_v42 = vand.u32 4294901760, %v1949_v55  ;;  %v6427_v46 = vand.u32 4294901760, %v5343_v16 }
 0x2e2   :  { %v6428_v62 = vand.u32 4294901760, %v5255_v59  ;;  %v5437_v27 = vpack.c.bf16 %v1956_v41, %v1944_v50  ;;  %v2672_v34 = vand.u32 4294901760, %v5326_v10  ;;  %v6431_v45 = vand.u32 4294901760, %v5364_v14 }
 0x2e3   :  { %6425 = vst [vmem:[#allocation74_spill] sm:$0xff] %v5414_v61  ;;  %3651 = vmatprep.subr.bf16.mxu1 %v5414_v61  ;;  %v5424_v2 = vand.u32 4294901760, %v6426_v32  ;;  %v5429_v18 = vsub.f32 %v5343_v16, %v6427_v46  ;;  %v6430_v32 = vsub.f32 %v5196_v29, %v5228_v60  ;;  %v1798_v25 = vpop.permute.xlu0 %1797  ;;  %v5450_v0 = vpack.c.bf16 %v2678_v44, %v2666_v13  ;;  %v6439_v61 = vld [vmem:[#allocation52_spill] sm:$0xff] }
 0x2e4   :  { %v5434_v20 = vsub.f32 %v5255_v59, %v6428_v62  ;;  %3653 = vmatpush1.bf16.msra.mxu1 %v5403_v39  ;;  %v5448_v46 = vsub.f32 %v5364_v14, %v6431_v45  ;;  %v5452_v59 = vpack.c.bf16 %v1962_v11, %v1950_v42  ;;  %v6432_v62 = vand.u32 4294901760, %v5379_v48  ;;  %v1800_v60 = vpop.permute.xlu1 %1799 }
 0x2e5   :  { %v5443_v55 = vand.u32 4294901760, %v6430_v32  ;;  %v6433_v50 = vand.u32 4294901760, %v5286_v8  ;;  %v1790_v45 = vsel %vm254_vm7, %v1784_v57, %v1786_v31  ;;  %v5467_v44 = vpack.c.bf16 %v2684_v35, %v2672_v34  ;;  %v6437_v34 = vld [vmem:[#allocation54_spill] sm:$0xff] }
 0x2e6   :  { %6429 = vst [vmem:[#allocation81_spill] sm:$0xff] %v5434_v20  ;;  %v5458_v10 = vsub.f32 %v5379_v48, %v6432_v62  ;;  %v1791_v11 = vsel %vm254_vm7, %v1782_v51, %v1784_v57  ;;  %v1789_v13 = vsel %vm254_vm7, %v1786_v31, %v1788_v58  ;;  %v1807_v42 = vsel %vm287_vm6, %v1798_v25, %v1800_v60  ;;  %v6442_v57 = vld [vmem:[#allocation53_spill] sm:$0xff] }
 0x2e7   :  { %v5463_v32 = vsub.f32 %v5286_v8, %v6433_v50  ;;  %v6435_v8 = vand.u32 4294901760, %v5275_v36  ;;  %v1792_v35 = vsel %vm254_vm7, %v1788_v58, %v1782_v51  ;;  %v5484_v41 = vmul.f32 %v1807_v42, %v6437_v34  ;;  %v1802_v56 = vpop.permute.xlu0 %1801  ;;  %v6441_v42 = vld [vmem:[#allocation50_spill] sm:$0xff] }
 0x2e8   :  { %v6438_v31 = vand.u32 4294901760, %v5289_v52  ;;  %v5493_v62 = vmul.f32 %v1790_v45, %v6439_v61  ;;  %v5503_v34 = vmul.f32 %v1791_v11, %v6441_v42  ;;  %v5506_v29 = vmul.f32 %v1789_v13, %v6442_v57  ;;  %v1804_v61 = vpop.permute.xlu1 %1803  ;;  %v6443_v45 = vld [vmem:[#allocation51_spill] sm:$0xff]  ;;  %v6445_v57 = vld [vmem:[#allocation57_spill] sm:$0xff] }
 0x2e9   :  { %6434 = vst [vmem:[#allocation82_spill] sm:$0xff] %v5463_v32  ;;  %v5479_v50 = vsub.f32 %v5275_v36, %v6435_v8  ;;  %v6440_v36 = vand.u32 4294901760, %v5407_v63  ;;  %v1805_v51 = vsel %vm287_vm6, %v1802_v56, %v1804_v61  ;;  %v1808_v58 = vsel %vm287_vm6, %v1804_v61, %v1798_v25 }
 0x2ea   :  { %v5490_v39 = vsub.f32 %v5289_v52, %v6438_v31  ;;  %v1806_v52 = vsel %vm287_vm6, %v1800_v60, %v1802_v56  ;;  %v5511_v31 = vmul.f32 %v1792_v35, %v6443_v45  ;;  %v1865_v13 = vand.u32 4294901760, %v5484_v41  ;;  %v6447_v45 = vld [vmem:[#allocation55_spill] sm:$0xff] }
 0x2eb   :  { %6436 = vst [vmem:[#allocation47_spill] sm:$0xff] %v5479_v50  ;;  %v5498_v8 = vsub.f32 %v5407_v63, %v6440_v36  ;;  %v1810_v36 = vmul.f32 %v1806_v52, %v6444_v22  ;;  %v5521_v42 = vmul.f32 %v1805_v51, %v6445_v57  ;;  %v6446_v60 = vand.u32 4294901760, %v5434_v20  ;;  %v1814_v40 = vpop.permute.xlu0 %1813 }
 0x2ec   :  { %v1859_v22 = vand.u32 4294901760, %v5493_v62  ;;  %v1812_v56 = vmul.f32 %v1808_v58, %v6447_v45  ;;  %v6448_v61 = vand.u32 4294901760, %v5463_v32  ;;  %v1861_v51 = vand.u32 4294901760, %v5503_v34  ;;  %v1816_v28 = vpop.permute.xlu1 %1815 }
 0x2ed   :  { %v5526_v35 = vsub.f32 %v5434_v20, %v6446_v60  ;;  %v1863_v52 = vand.u32 4294901760, %v1810_v36  ;;  %v6158_v57 = vand.u32 4294901760, %v5506_v29  ;;  %v2587_v60 = vand.u32 4294901760, %v5521_v42  ;;  %v6460_v20 = vld [vmem:[#allocation61_spill] sm:$0xff] }
 0x2ee   :  { %v5534_v11 = vsub.f32 %v5463_v32, %v6448_v61  ;;  %v2581_v1 = vand.u32 4294901760, %v5511_v31  ;;  %v2585_v47 = vand.u32 4294901760, %v1812_v56  ;;  %v1823_v58 = vsel %vm320_vm8, %v1814_v40, %v1816_v28 }
 0x2ef   :  { %v5542_v45 = vpack.c.bf16 %v1863_v52, %v1859_v22  ;;  %v6450_v25 = vand.u32 4294901760, %v5321_v19  ;;  %v5549_v9 = vpack.c.bf16 %v1865_v13, %v1861_v51  ;;  %v5553_v48 = vpack.c.bf16 %v2587_v60, %v6158_v57  ;;  %v1818_v63 = vpop.permute.xlu0 %1817 }
 0x2f0   :  { %v5556_v30 = vmul.f32 %v1823_v58, %v6453_v37  ;;  %v6454_v32 = vand.u32 4294901760, %v5346_v38  ;;  %v5564_v17 = vpack.c.bf16 %v2585_v47, %v2581_v1  ;;  %v6456_v57 = vand.u32 4294901760, %v5479_v50 }
 0x2f1   :  { %6449 = vst [vmem:[#allocation78_spill] sm:$0xff] %v5542_v45  ;;  %v5547_v61 = vsub.f32 %v5321_v19, %v6450_v25  ;;  %6451 = vst [vmem:[#allocation79_spill] sm:$0xff] %v5549_v9  ;;  %3547 = vmatprep.subr.bf16.mxu0 %v5542_v45  ;;  %v2690_v19 = vand.u32 4294901760, %v5498_v8  ;;  %v6457_v37 = vand.u32 4294901760, %v5368_v23  ;;  %v1980_v8 = vand.u32 4294901760, %v5526_v35  ;;  %v6458_v45 = vld [vmem:[#allocation60_spill] sm:$0xff] }
 0x2f2   :  { %6452 = vst [vmem:[#allocation80_spill] sm:$0xff] %v5553_v48  ;;  %v5561_v14 = vsub.f32 %v5346_v38, %v6454_v32  ;;  %6455 = vst [vmem:[#allocation18_spill] sm:$0xff] %v5564_v17  ;;  %v5571_v24 = vsub.f32 %v5479_v50, %v6456_v57  ;;  %v1822_v38 = vsel %vm320_vm8, %v1816_v28, %v1818_v63  ;;  %v1820_v32 = vpop.permute.xlu1 %1819  ;;  %3549 = vmatpush1.bf16.msra.mxu0 %v5549_v9 }
 0x2f3   :  { %v5576_v58 = vsub.f32 %v5368_v23, %v6457_v37  ;;  %v1826_v25 = vmul.f32 %v1822_v38, %v6458_v45  ;;  %3655 = vmatprep.subr.bf16.mxu1 %v5564_v17  ;;  %v1821_v57 = vsel %vm320_vm8, %v1818_v63, %v1820_v32  ;;  %v1824_v50 = vsel %vm320_vm8, %v1820_v32, %v1814_v40 }
 0x2f4   :  { %v6459_v23 = vand.u32 4294901760, %v5490_v39  ;;  %v1869_v9 = vand.u32 4294901760, %v5556_v30  ;;  %v5594_v35 = vmul.f32 %v1821_v57, %v6460_v20  ;;  %3657 = vmatpush1.bf16.msra.mxu1 %v5553_v48  ;;  %v1986_v45 = vand.u32 4294901760, %v5534_v11 }
 0x2f5   :  { %v5598_v38 = vsub.f32 %v1810_v36, %v1863_v52  ;;  %v1867_v63 = vand.u32 4294901760, %v1826_v25  ;;  %v1828_v40 = vmul.f32 %v1824_v50, %v6461_v15  ;;  %v2708_v20 = vand.u32 4294901760, %v5571_v24 }
 0x2f6   :  { %v2701_v37 = vsub.f32 %v5490_v39, %v6459_v23  ;;  %v6462_v23 = vand.u32 4294901760, %v5358_v5  ;;  %v6171_v17 = vand.u32 4294901760, %v5594_v35  ;;  %v6172_v57 = vand.u32 4294901760, %v5576_v58 }
 0x2f7   :  { %v5611_v11 = vsub.f32 %v5493_v62, %v1859_v22  ;;  %v5613_v36 = vsub.f32 %v1812_v56, %v2585_v47  ;;  %v2589_v52 = vand.u32 4294901760, %v1828_v40  ;;  %v6463_v50 = vmov 1.0  }
 0x2f8   :  { %v5605_v28 = vsub.f32 %v5358_v5, %v6462_v23  ;;  %v5616_v15 = vpack.c.bf16 %v6463_v50, %v1867_v63  ;;  %v5619_v32 = vsub.f32 %v5484_v41, %v1865_v13  ;;  %v5622_v5 = vpack.c.bf16 %v6463_v50, %v1869_v9 }
 0x2f9   :  { %v5627_v24 = vpack.c.bf16 %v6463_v50, %v6171_v17  ;;  %v2702_v23 = vand.u32 4294901760, %v2701_v37  ;;  %v5630_v62 = vsub.f32 %v5511_v31, %v2581_v1  ;;  %v5634_v47 = vpack.c.bf16 %v6463_v50, %v2589_v52 }
 0x2fa   :  { %6464 = vst [vmem:[#allocation21_spill] sm:$0xff] %v5616_v15  ;;  %3551 = vmatprep.subr.bf16.mxu0 %v5616_v15  ;;  %v6465_v41 = vand.u32 4294901760, %v5561_v14  ;;  %v6182_v22 = vand.u32 4294901760, %v5598_v38  ;;  %v6466_v56 = vand.u32 4294901760, %v5547_v61  ;;  %v5645_v1 = vsub.f32 %v5503_v34, %v1861_v51 }
 0x2fb   :  { %v5648_v31 = vsub.f32 %v5521_v42, %v2587_v60  ;;  %3553 = vmatpush1.bf16.msra.mxu0 %v5622_v5  ;;  %3659 = vmatprep.subr.bf16.mxu1 %v5634_v47  ;;  %v6467_v50 = vand.u32 4294901760, %v5429_v18  ;;  %v6183_v37 = vand.u32 4294901760, %v5611_v11  ;;  %v6180_v34 = vand.u32 4294901760, %v5613_v36 }
 0x2fc   :  { %v2003_v13 = vsub.f32 %v5561_v14, %v6465_v41  ;;  %v2009_v17 = vsub.f32 %v5547_v61, %v6466_v56  ;;  %3555 = vmatprep.subr.bf16.mxu0 %v5437_v27  ;;  %v2725_v56 = vsub.f32 %v5576_v58, %v6172_v57  ;;  %v6468_v42 = vand.u32 4294901760, %v5506_v29  ;;  %3661 = vmatpush1.bf16.msra.mxu1 %v5627_v24 }
 0x2fd   :  { %v3558_v41 = vpack.c.bf16 %v1980_v8, %v6467_v50  ;;  %v3666_v27 = vpack.c.bf16 %v2702_v23, %v2690_v19  ;;  %v6469_v18 = vand.u32 4294901760, %v5448_v46  ;;  %v5669_v50 = vsub.f32 %v1826_v25, %v1867_v63  ;;  %3663 = vmatprep.subr.bf16.mxu1 %v5450_v0 }
 0x2fe   :  { %v5663_v51 = vsub.f32 %v5506_v29, %v6468_v42  ;;  %1923 = vmatmul.mubr.f32.vlgmr.msra.gmra.mrb[2].mxu0 %v5424_v2  ;;  %v2004_v57 = vand.u32 4294901760, %v2003_v13  ;;  %v2027_v29 = vsub.f32 %v5598_v38, %v6182_v22  ;;  %v6181_v42 = vand.u32 4294901760, %v5630_v62 }
 0x2ff   :  { %v3560_v8 = vpack.c.bf16 %v1986_v45, %v6469_v18  ;;  %v6470_v60 = vand.u32 4294901760, %v5605_v28  ;;  %v6179_v46 = vand.u32 4294901760, %v5645_v1  ;;  %v6173_v25 = vand.u32 4294901760, %v5648_v31  ;;  %3557 = vmatpush1.bf16.msra.mxu0 %v5452_v59  ;;  %1928 = vmatprep.mubr.f32.mxu0 %v6295_v6 }
 0x300   :  { %v6471_v0 = vand.u32 4294901760, %v5458_v10  ;;  %v5686_v63 = vsub.f32 %v1828_v40, %v2589_v52  ;;  %3559 = vmatprep.subr.bf16.mxu0 %v3558_v41  ;;  %2645 = vmatmul.mubr.f32.vlgmr.msra.gmra.mrb[2].mxu1 %v5424_v2  ;;  %v2726_v23 = vand.u32 4294901760, %v2725_v56  ;;  %v2015_v13 = vsub.f32 %v5611_v11, %v6183_v37 }
 0x301   :  { %v2731_v19 = vsub.f32 %v5605_v28, %v6470_v60  ;;  %v2749_v60 = vsub.f32 %v5613_v36, %v6180_v34  ;;  %v6177_v59 = vand.u32 4294901760, %v5663_v51  ;;  %v6472_v10 = vand.u32 4294901760, %v5619_v32  ;;  %3665 = vmatpush1.bf16.msra.mxu1 %v5467_v44  ;;  %2650 = vmatprep.mubr.f32.mxu1 %v6295_v6 }
 0x302   :  { %v3668_v45 = vpack.c.bf16 %v2708_v20, %v6471_v0  ;;  %v5700_v40 = vsub.f32 %v5556_v30, %v1869_v9  ;;  %v2010_v2 = vand.u32 4294901760, %v2009_v17  ;;  %3667 = vmatprep.subr.bf16.mxu1 %v3666_v27  ;;  %v6473_v52 = vand.u32 4294901760, %v5209_v21  ;;  %1934 = vmatmul.mubr.f32.gmra.mrb[4].mxu0 %v5443_v55 }
 0x303   :  { %v2033_v20 = vsub.f32 %v5619_v32, %v6472_v10  ;;  %v2028_v56 = vand.u32 4294901760, %v2027_v29  ;;  %v2737_v18 = vsub.f32 %v5630_v62, %v6181_v42  ;;  %v6178_v0 = vand.u32 4294901760, %v5669_v50  ;;  %3561 = vmatpush1.bf16.msra.mxu0 %v3560_v8  ;;  %2094 = vmatprep.mubr.f32.mxu0 %v6295_v6 }
 0x304   :  { %v3562_v41 = vpack.c.bf16 %v2004_v57, %v6473_v52  ;;  %v2021_v30 = vsub.f32 %v5645_v1, %v6179_v46  ;;  %v2755_v9 = vsub.f32 %v5648_v31, %v6173_v25  ;;  %v6474_v21 = vand.u32 4294901760, %v5594_v35  ;;  %2656 = vmatmul.mubr.f32.gmra.mrb[4].mxu1 %v5443_v55  ;;  %v6507_v46 = vld [vmem:[#allocation79_spill] sm:$0xff] }
 0x305   :  { %v2732_v44 = vand.u32 4294901760, %v2731_v19  ;;  %v6475_v57 = vand.u32 4294901760, %v5236_v43  ;;  %v2016_v29 = vand.u32 4294901760, %v2015_v13  ;;  %v2750_v10 = vand.u32 4294901760, %v2749_v60  ;;  %3669 = vmatpush1.bf16.msra.mxu1 %v3668_v45  ;;  %2816 = vmatprep.mubr.f32.mxu1 %v6295_v6 }
 0x306   :  { %v5720_v17 = vsub.f32 %v5594_v35, %v6474_v21  ;;  %3563 = vmatprep.subr.bf16.mxu0 %v3562_v41  ;;  %v6176_v52 = vand.u32 4294901760, %v5686_v63  ;;  %v2743_v25 = vsub.f32 %v5663_v51, %v6177_v59  ;;  %v6175_v35 = vand.u32 4294901760, %v5700_v40  ;;  %v6505_v59 = vld [vmem:[#allocation70_spill] sm:$0xff] }
 0x307   :  { %v3670_v27 = vpack.c.bf16 %v2726_v23, %v6475_v57  ;;  %v6476_v8 = vand.u32 4294901760, %v5214_v53  ;;  %v2034_v41 = vand.u32 4294901760, %v2033_v20  ;;  %v3566_v43 = vpack.c.bf16 %v2028_v56, %v2016_v29 }
 0x308   :  { %v2738_v23 = vand.u32 4294901760, %v2737_v18  ;;  %v2039_v55 = vsub.f32 %v5669_v50, %v6178_v0  ;;  %v6174_v13 = vand.u32 4294901760, %v5720_v17  ;;  %v6477_v60 = vand.u32 4294901760, %v5219_v4  ;;  %v6506_v0 = vld [vmem:[#allocation18_spill] sm:$0xff] }
 0x309   :  { %v3564_v19 = vpack.c.bf16 %v2010_v2, %v6476_v8  ;;  %3671 = vmatprep.subr.bf16.mxu1 %v3670_v27  ;;  %v2022_v45 = vand.u32 4294901760, %v2021_v30  ;;  %v2756_v57 = vand.u32 4294901760, %v2755_v9  ;;  %v2761_v20 = vsub.f32 %v5686_v63, %v6176_v52  ;;  %v6504_v52 = vld [vmem:[#allocation78_spill] sm:$0xff] }
 0x30a   :  { %v3672_v21 = vpack.c.bf16 %v2732_v44, %v6477_v60  ;;  %v3674_v53 = vpack.c.bf16 %v2750_v10, %v2738_v23  ;;  %v2744_v56 = vand.u32 4294901760, %v2743_v25  ;;  %v2045_v18 = vsub.f32 %v5700_v40, %v6175_v35  ;;  %v6480_v23 = vld [vmem:[#allocation48_spill] sm:$0xff]  ;;  %v6481_v60 = vld [vmem:[#allocation75_spill] sm:$0xff]  ;;  %v6503_v35 = vld [vmem:[#allocation73_spill] sm:$0xff] }
 0x30b   :  { %3565 = vmatpush1.bf16.msra.mxu0 %v3564_v19  ;;  %v3568_v2 = vpack.c.bf16 %v2034_v41, %v2022_v45  ;;  %v2040_v27 = vand.u32 4294901760, %v2039_v55  ;;  %v2767_v30 = vsub.f32 %v5720_v17, %v6174_v13  ;;  %v2762_v9 = vand.u32 4294901760, %v2761_v20  ;;  %v6478_v19 = vld [vmem:[#allocation81_spill] sm:$0xff]  ;;  %v6482_v45 = vld [vmem:[#allocation66_spill] sm:$0xff]  ;;  %v6501_v13 = vld [vmem:[#allocation64_spill] sm:$0xff] }
 0x30c   :  { %3567 = vmatprep.subr.bf16.mxu0 %v3566_v43  ;;  %3673 = vmatpush1.bf16.msra.mxu1 %v3672_v21  ;;  %v3676_v4 = vpack.c.bf16 %v2756_v57, %v2744_v56  ;;  %v2046_v44 = vand.u32 4294901760, %v2045_v18  ;;  %v3570_v25 = vpack.c.bf16 %v5263_v49, %v5230_v26  ;;  %v3572_v10 = vpack.c.bf16 %v5282_v54, %v5258_v7  ;;  %v6479_v43 = vld [vmem:[#allocation45_spill] sm:$0xff]  ;;  %v6483_v57 = vld [vmem:[#allocation82_spill] sm:$0xff]  ;;  %v6485_v56 = vld [vmem:[#allocation71_spill] sm:$0xff] }
 0x30d   :  { %3675 = vmatprep.subr.bf16.mxu1 %v3674_v53  ;;  %v2768_v29 = vand.u32 4294901760, %v2767_v30  ;;  %v3678_v8 = vpack.c.bf16 %v5296_v33, %v5260_v12  ;;  %v3574_v41 = vpack.c.bf16 %v6478_v19, %v5343_v16  ;;  %v3680_v55 = vpack.c.bf16 %v6480_v23, %v6479_v43  ;;  %v6484_v20 = vld [vmem:[#allocation41_spill] sm:$0xff] }
 0x30e   :  { %v3682_v21 = vpack.c.bf16 %v5490_v39, %v6481_v60  ;;  %v3576_v53 = vpack.c.bf16 %v6483_v57, %v6482_v45  ;;  %v6486_v18 = vld [vmem:[#allocation65_spill] sm:$0xff]  ;;  %v6509_v34 = vand.u32 4294901760, %v5263_v49  ;;  %v6510_v22 = vand.u32 4294901760, %v5260_v12 }
 0x30f   :  { %3569 = vmatpush1.bf16.msra.mxu0 %v3568_v2  ;;  %v3578_v2 = vpack.c.bf16 %v5561_v14, %v6484_v20  ;;  %v6488_v30 = vld [vmem:[#allocation77_spill] sm:$0xff]  ;;  %v6511_v37 = vand.u32 4294901760, %v5296_v33  ;;  %v6515_v49 = vand.u32 4294901760, %v5343_v16  ;;  %v6517_v12 = vand.u32 4294901760, %v6479_v43 }
 0x310   :  { %2041 = vmatprep.subr.mxu0 %v2040_v27  ;;  %3677 = vmatpush1.bf16.msra.mxu1 %v3676_v4  ;;  %v6487_v27 = vld [vmem:[#allocation47_spill] sm:$0xff]  ;;  %v6518_v33 = vand.u32 4294901760, %v6480_v23  ;;  %v6526_v43 = vand.u32 4294901760, %v6486_v18 }
 0x311   :  { %2763 = vmatprep.subr.mxu1 %v2762_v9  ;;  %v3684_v4 = vpack.c.bf16 %v6487_v27, %v6486_v18  ;;  %v3686_v9 = vpack.c.bf16 %v5576_v58, %v6488_v30  ;;  %v6532_v18 = vand.u32 4294901760, %v5611_v11 }
 0x313   :  { %2047 = vmatpush1.msra.mxu0 %v2046_v44  ;;  %v6489_v44 = vld [vmem:[#allocation62_spill] sm:$0xff] }
 0x314   :  { %3571 = vmatprep.subr.bf16.mxu0 %v3570_v25  ;;  %2096 = vmatmul.mubr.f32.vlgmr.msra.gmra.mrb[2].mxu0 %v5155_v3  ;;  %v3580_v25 = vpack.c.bf16 %v5547_v61, %v6489_v44 }
 0x315   :  { %2769 = vmatpush1.msra.mxu1 %v2768_v29  ;;  %3573 = vmatpush1.bf16.msra.mxu0 %v3572_v10  ;;  %v3582_v29 = vpack.c.bf16 %v5598_v38, %v5611_v11  ;;  %v6490_v10 = vld [vmem:[#allocation63_spill] sm:$0xff]  ;;  %v6538_v11 = vand.u32 4294901760, %v5645_v1 }
 0x316   :  { %3679 = vmatprep.subr.bf16.mxu1 %v3678_v8  ;;  %3575 = vmatprep.subr.bf16.mxu0 %v3574_v41  ;;  %v3688_v8 = vpack.c.bf16 %v5605_v28, %v6490_v10  ;;  %v3690_v41 = vpack.c.bf16 %v5613_v36, %v5630_v62 }
 0x317   :  { %2818 = vmatmul.mubr.f32.vlgmr.msra.gmra.mrb[2].mxu1 %v5155_v3  ;;  %2101 = vmatprep.mubr.f32.mxu0 %v6295_v6 }
 0x318   :  { %3681 = vmatpush1.bf16.msra.mxu1 %v3680_v55  ;;  %2103 = vmatmul.mubr.f32.gmra.mrb[4].mxu0 %v6485_v56  ;;  %v3584_v55 = vpack.c.bf16 %v5619_v32, %v5645_v1  ;;  %v6546_v1 = vld [vmem:[#allocation18_spill] sm:$0xff] }
 0x319   :  { %3683 = vmatprep.subr.bf16.mxu1 %v3682_v21  ;;  %3577 = vmatpush1.bf16.msra.mxu0 %v3576_v53  ;;  %v3692_v21 = vpack.c.bf16 %v5648_v31, %v5663_v51  ;;  %v6491_v53 = vld [vmem:[#allocation68_spill] sm:$0xff] }
 0x31a   :  { %3579 = vmatprep.subr.bf16.mxu0 %v3578_v2  ;;  %2823 = vmatprep.mubr.f32.mxu1 %v6295_v6  ;;  %v6492_v2 = vld [vmem:[#allocation72_spill] sm:$0xff] }
 0x31b   :  { %2825 = vmatmul.mubr.f32.gmra.mrb[4].mxu1 %v6485_v56  ;;  %2209 = vmatprep.mubr.f32.mxu0 %v6295_v6 }
 0x31c   :  { %3685 = vmatpush1.bf16.msra.mxu1 %v3684_v4  ;;  %2931 = vmatprep.mubr.f32.mxu1 %v6295_v6  ;;  %v6493_v4 = vld [vmem:[#allocation76_spill] sm:$0xff] }
 0x31d   :  { %3687 = vmatprep.subr.bf16.mxu1 %v3686_v9  ;;  %3581 = vmatpush1.bf16.msra.mxu0 %v3580_v25  ;;  %v6494_v9 = vld [vmem:[#allocation44_spill] sm:$0xff] }
 0x31e   :  { %3583 = vmatprep.subr.bf16.mxu0 %v3582_v29  ;;  %v6495_v25 = vld [vmem:[#allocation40_spill] sm:$0xff]  ;;  %v6496_v29 = vld [vmem:[#allocation42_spill] sm:$0xff] }
 0x320   :  { %3689 = vmatpush1.bf16.msra.mxu1 %v3688_v8  ;;  %v6497_v8 = vld [vmem:[#allocation69_spill] sm:$0xff] }
 0x321   :  { %3691 = vmatprep.subr.bf16.mxu1 %v3690_v41  ;;  %3585 = vmatpush1.bf16.msra.mxu0 %v3584_v55  ;;  %v6498_v41 = vld [vmem:[#allocation49_spill] sm:$0xff]  ;;  %v6499_v55 = vld [vmem:[#allocation46_spill] sm:$0xff] }
 0x322   :  { %2159 = vmatprep.subr.mxu0 %v5669_v50 }
 0x324   :  { %3693 = vmatpush1.bf16.msra.mxu1 %v3692_v21  ;;  %v6500_v21 = vld [vmem:[#allocation67_spill] sm:$0xff] }
 0x325   :  { %2881 = vmatprep.subr.mxu1 %v5686_v63  ;;  %2162 = vmatpush1.msra.mxu0 %v5700_v40 }
 0x326   :  { %3587 = vmatprep.subr.bf16.mxu0 %v6491_v53  ;;  %2212 = vmatmul.mubr.f32.vlgmr.msra.gmra.mrb[2].mxu0 %v6492_v2 }
 0x327   :  { %3589 = vmatpush1.bf16.msra.mxu0 %v6493_v4  ;;  %2217 = vmatprep.mubr.f32.mxu0 %v6295_v6 }
 0x328   :  { %2884 = vmatpush1.msra.mxu1 %v5720_v17  ;;  %3591 = vmatprep.subr.bf16.mxu0 %v6494_v9 }
 0x329   :  { %3695 = vmatprep.subr.bf16.mxu1 %v6495_v25  ;;  %2934 = vmatmul.mubr.f32.vlgmr.msra.gmra.mrb[2].mxu1 %v6492_v2  ;;  %v6502_v2 = vld [vmem:[#allocation74_spill] sm:$0xff] }
 0x32a   :  { %3697 = vmatpush1.bf16.msra.mxu1 %v6496_v29  ;;  %2220 = vmatmul.mubr.f32.gmra.mrb[4].mxu0 %v6497_v8 }
 0x32b   :  { %3699 = vmatprep.subr.bf16.mxu1 %v6498_v41  ;;  %3593 = vmatpush1.bf16.msra.mxu0 %v6499_v55 }
 0x32c   :  { %3595 = vmatprep.subr.bf16.mxu0 %v6500_v21  ;;  %2939 = vmatprep.mubr.f32.mxu1 %v6295_v6 }
 0x32d   :  { %2942 = vmatmul.mubr.f32.gmra.mrb[4].mxu1 %v6497_v8  ;;  %2308 = vmatprep.mubr.f32.mxu0 %v6295_v6  ;;  %v6508_v8 = vand.u32 4294901760, %v5230_v26  ;;  %v6514_v26 = vld [vmem:[#allocation35_spill] sm:$0xff] }
 0x32e   :  { %3701 = vmatpush1.bf16.msra.mxu1 %v6501_v13  ;;  %3030 = vmatprep.mubr.f32.mxu1 %v6295_v6 }
 0x32f   :  { %3703 = vmatprep.subr.bf16.mxu1 %v6502_v2  ;;  %3597 = vmatpush1.bf16.msra.mxu0 %v6503_v35  ;;  %v3606_v42 = vpack.c.bf16 %v6509_v34, %v6508_v8  ;;  %v6516_v34 = vand.u32 4294901760, %v6478_v19  ;;  %v6525_v19 = vld [vmem:[#allocation43_spill] sm:$0xff] }
 0x330   :  { %3599 = vmatprep.subr.bf16.mxu0 %v6504_v52 }
 0x331   :  { %v3610_v8 = vpack.c.bf16 %v6516_v34, %v6515_v49  ;;  %v6537_v34 = vand.u32 4294901760, %v5613_v36  ;;  %v6543_v36 = vand.u32 4294901760, %v5686_v63 }
 0x332   :  { %3705 = vmatpush1.bf16.msra.mxu1 %v6505_v59 }
 0x333   :  { %3707 = vmatprep.subr.bf16.mxu1 %v6506_v0  ;;  %3601 = vmatpush1.bf16.msra.mxu0 %v6507_v46  ;;  %v3714_v0 = vpack.c.bf16 %v6511_v37, %v6510_v22  ;;  %v6512_v46 = vand.u32 4294901760, %v5258_v7  ;;  %v3716_v7 = vpack.c.bf16 %v6518_v33, %v6517_v12  ;;  %v6521_v22 = vand.u32 4294901760, %v6482_v45 }
 0x334   :  { %3603 = vmatprep.subr.bf16.mxu0 %v5616_v15  ;;  %v6513_v15 = vand.u32 4294901760, %v5282_v54  ;;  %v6519_v54 = vand.u32 4294901760, %v6481_v60  ;;  %v6522_v37 = vand.u32 4294901760, %v6483_v57  ;;  %v6528_v60 = vand.u32 4294901760, %v6488_v30 }
 0x335   :  { %v6529_v45 = vand.u32 4294901760, %v5576_v58  ;;  %v6534_v58 = vand.u32 4294901760, %v6490_v10  ;;  %v6540_v33 = vand.u32 4294901760, %v5669_v50  ;;  %v6541_v10 = vand.u32 4294901760, %v5663_v51  ;;  %v6548_v51 = vld [vmem:[#allocation21_spill] sm:$0xff]  ;;  %v6549_v50 = vld [vmem:[#allocation80_spill] sm:$0xff] }
 0x336   :  { %3709 = vmatpush1.bf16.msra.mxu1 %v5553_v48  ;;  %v3608_v48 = vpack.c.bf16 %v6513_v15, %v6512_v46  ;;  %v6520_v15 = vand.u32 4294901760, %v5490_v39  ;;  %v6524_v46 = vand.u32 4294901760, %v5561_v14  ;;  %v6527_v39 = vand.u32 4294901760, %v6487_v27 }
 0x337   :  { %3711 = vmatprep.subr.bf16.mxu1 %v5634_v47  ;;  %3605 = vmatpush1.bf16.msra.mxu0 %v5622_v5  ;;  %v3722_v57 = vpack.c.bf16 %v6529_v45, %v6528_v60  ;;  %v6530_v14 = vand.u32 4294901760, %v6489_v44  ;;  %v6533_v27 = vand.u32 4294901760, %v5598_v38  ;;  %v6536_v44 = vand.u32 4294901760, %v5630_v62 }
 0x338   :  { %3607 = vmatprep.subr.bf16.mxu0 %v3606_v42  ;;  %v3718_v16 = vpack.c.bf16 %v6520_v15, %v6519_v54  ;;  %v6523_v42 = vand.u32 4294901760, %v6484_v20  ;;  %v3720_v23 = vpack.c.bf16 %v6527_v39, %v6526_v43  ;;  %v6531_v20 = vand.u32 4294901760, %v5547_v61 }
 0x339   :  { %v3618_v49 = vpack.c.bf16 %v6533_v27, %v6532_v18  ;;  %v6535_v61 = vand.u32 4294901760, %v5605_v28  ;;  %v6539_v38 = vand.u32 4294901760, %v5619_v32  ;;  %v6542_v28 = vand.u32 4294901760, %v5648_v31  ;;  %v6547_v31 = vld [vmem:[#allocation79_spill] sm:$0xff] }
 0x33a   :  { %3713 = vmatpush1.bf16.msra.mxu1 %v5627_v24  ;;  %2312 = vmatmul.mubr.f32.vlgmr.msra.gmra.mrb[2].mxu0 %v6514_v26  ;;  %v6544_v62 = vand.u32 4294901760, %v5700_v40  ;;  %v6545_v32 = vand.u32 4294901760, %v5720_v17 }
 0x33b   :  { %3715 = vmatprep.subr.bf16.mxu1 %v3714_v0  ;;  %3609 = vmatpush1.bf16.msra.mxu0 %v3608_v48  ;;  %v3612_v48 = vpack.c.bf16 %v6522_v37, %v6521_v22  ;;  %v3614_v0 = vpack.c.bf16 %v6524_v46, %v6523_v42  ;;  %v3724_v30 = vpack.c.bf16 %v6535_v61, %v6534_v58 }
 0x33c   :  { %3611 = vmatprep.subr.bf16.mxu0 %v3610_v8  ;;  %2317 = vmatprep.mubr.f32.mxu0 %v6295_v6  ;;  %v3726_v8 = vpack.c.bf16 %v6537_v34, %v6536_v44  ;;  %v3620_v12 = vpack.c.bf16 %v6539_v38, %v6538_v11 }
 0x33d   :  { %3034 = vmatmul.mubr.f32.vlgmr.msra.gmra.mrb[2].mxu1 %v6514_v26  ;;  %v3616_v26 = vpack.c.bf16 %v6531_v20, %v6530_v14 }
 0x33e   :  { %3717 = vmatpush1.bf16.msra.mxu1 %v3716_v7  ;;  %2321 = vmatmul.mubr.f32.gmra.mrb[4].mxu0 %v6525_v19  ;;  %v3728_v7 = vpack.c.bf16 %v6542_v28, %v6541_v10 }
 0x33f   :  { %3719 = vmatprep.subr.bf16.mxu1 %v3718_v16  ;;  %3613 = vmatpush1.bf16.msra.mxu0 %v3612_v48 }
 0x340   :  { %3615 = vmatprep.subr.bf16.mxu0 %v3614_v0  ;;  %3039 = vmatprep.mubr.f32.mxu1 %v6295_v6 }
 0x341   :  { %3043 = vmatmul.mubr.f32.gmra.mrb[4].mxu1 %v6525_v19  ;;  %2445 = vmatprep.mubr.f32.mxu0 %v6295_v6 }
 0x342   :  { %3721 = vmatpush1.bf16.msra.mxu1 %v3720_v23  ;;  %3167 = vmatprep.mubr.f32.mxu1 %v6295_v6 }
 0x343   :  { %3723 = vmatprep.subr.bf16.mxu1 %v3722_v57  ;;  %3617 = vmatpush1.bf16.msra.mxu0 %v3616_v26 }
 0x344   :  { %3619 = vmatprep.subr.bf16.mxu0 %v3618_v49 }
 0x346   :  { %3725 = vmatpush1.bf16.msra.mxu1 %v3724_v30 }
 0x347   :  { %3727 = vmatprep.subr.bf16.mxu1 %v3726_v8  ;;  %3621 = vmatpush1.bf16.msra.mxu0 %v3620_v12 }
 0x348   :  { %2394 = vmatprep.subr.mxu0 %v6540_v33 }
 0x34a   :  { %3729 = vmatpush1.bf16.msra.mxu1 %v3728_v7 }
 0x34b   :  { %3116 = vmatprep.subr.mxu1 %v6543_v36  ;;  %2398 = vmatpush1.msra.mxu0 %v6544_v62 }
 0x34c   :  { %3623 = vmatprep.subr.bf16.mxu0 %v6491_v53  ;;  %2447 = vmatmul.mubr.f32.vlgmr.msra.gmra.mrb[2].mxu0 %v5155_v3 }
 0x34d   :  { %3625 = vmatpush1.bf16.msra.mxu0 %v6493_v4  ;;  %2452 = vmatprep.mubr.f32.mxu0 %v6295_v6 }
 0x34e   :  { %3120 = vmatpush1.msra.mxu1 %v6545_v32  ;;  %3627 = vmatprep.subr.bf16.mxu0 %v6494_v9 }
 0x34f   :  { %3731 = vmatprep.subr.bf16.mxu1 %v6495_v25  ;;  %3169 = vmatmul.mubr.f32.vlgmr.msra.gmra.mrb[2].mxu1 %v5155_v3 }
 0x350   :  { %3733 = vmatpush1.bf16.msra.mxu1 %v6496_v29  ;;  %2454 = vmatmul.mubr.f32.gmra.mrb[4].mxu0 %v6485_v56 }
 0x351   :  { %3735 = vmatprep.subr.bf16.mxu1 %v6498_v41  ;;  %3629 = vmatpush1.bf16.msra.mxu0 %v6499_v55 }
 0x352   :  { %3631 = vmatprep.subr.bf16.mxu0 %v6500_v21  ;;  %3174 = vmatprep.mubr.f32.mxu1 %v6295_v6 }
 0x353   :  { %3176 = vmatmul.mubr.f32.gmra.mrb[4].mxu1 %v6485_v56  ;;  %2542 = vmatprep.mubr.f32.mxu0 %v6295_v6 }
 0x354   :  { %3737 = vmatpush1.bf16.msra.mxu1 %v6501_v13  ;;  %3264 = vmatprep.mubr.f32.mxu1 %v6295_v6 }
 0x355   :  { %3739 = vmatprep.subr.bf16.mxu1 %v6502_v2  ;;  %3633 = vmatpush1.bf16.msra.mxu0 %v6503_v35 }
 0x356   :  { %3635 = vmatprep.subr.bf16.mxu0 %v6504_v52 }
 0x358   :  { %3741 = vmatpush1.bf16.msra.mxu1 %v6505_v59 }
 0x359   :  { %3743 = vmatprep.subr.bf16.mxu1 %v6546_v1  ;;  %3637 = vmatpush1.bf16.msra.mxu0 %v6547_v31 }
 0x35a   :  { %3639 = vmatprep.subr.bf16.mxu0 %v6548_v51 }
 0x35c   :  { %3745 = vmatpush1.bf16.msra.mxu1 %v6549_v50 }
 0x35d   :  { %3747 = vmatprep.subr.bf16.mxu1 %v5634_v47  ;;  %3641 = vmatpush1.bf16.msra.mxu0 %v5622_v5 }
 0x360   :  { %3749 = vmatpush1.bf16.msra.mxu1 %v5627_v24  ;;  %2544 = vmatmul.mubr.f32.vlgmr.msra.gmra.mrb[2].mxu0 %v5155_v3 }
 0x361   :  { %2549 = vmatprep.mubr.f32.mxu0 %v6295_v6 }
 0x363   :  { %3266 = vmatmul.mubr.f32.vlgmr.msra.gmra.mrb[2].mxu1 %v5155_v3 }
 0x364   :  { %2551 = vmatmul.mubr.f32.gmra.mrb[4].mxu0 %v6485_v56  ;;  %3271 = vmatprep.mubr.f32.mxu1 %v6295_v6 }
 0x367   :  { %3273 = vmatmul.mubr.f32.gmra.mrb[4].mxu1 %v6485_v56 }
 0x433   :  { %v2545_v63 = vpop.f32.mrb[2].mxu0 }
 0x434   :  { %3279 = vst [vmem:[#allocation10] sm:$0xff] %v2545_v63  ;;  %v2547_v47 = vpop.f32.mrb[3].mxu0 }
 0x435   :  { %3280 = vst [vmem:[#allocation10 + $0x8] sm:$0xff] %v2547_v47 }
 0x436   :  { %v3267_v5 = vpop.f32.mrb[2].mxu1 }
 0x437   :  { %3281 = vst [vmem:[#allocation10 + $0x10] sm:$0xff] %v3267_v5  ;;  %v3269_v24 = vpop.f32.mrb[3].mxu1  ;;  %v2552_v59 = vpop.f32.mrb[4].mxu0 }
 0x438   :  { %3282 = vst [vmem:[#allocation10 + $0x18] sm:$0xff] %v3269_v24  ;;  %3283 = vst [vmem:[#allocation11] sm:$0xff] %v2552_v59  ;;  %v2554_v3 = vpop.f32.mrb[5].mxu0 }
 0x439   :  { %3284 = vst [vmem:[#allocation11 + $0x8] sm:$0xff] %v2554_v3 }
 0x43a   :  { %3927 = shalt.err (!%p3924_p8)
}
 0x43b   :  { %s3928_s21 = scalar_lea.hbm %s5963_s4, 512 }
 0x43c   :  { %p3929_p9 = scmp.ne.s32.totalorder %s5963_s4, %s3928_s21  ;;  %p3932_p10 = scmp.lt.u32.totalorder %s3928_s21, %s5963_s4 }
 0x43e   :  { %p3934_p11 = pnand %p3932_p10, %p3929_p9 }
 0x440   :  { %3937 = shalt.err (!%p3934_p11)
}
 0x441   :  { %3296 = dma.vmem_to_hbm [thread:$0]  %s3294_s23, 512, %s5963_s4, [#allocation4]   ;;  %v3274_v6 = vpop.f32.mrb[4].mxu1 }
 0x442   :  { %3285 = vst [vmem:[#allocation11 + $0x10] sm:$0xff] %v3274_v6  ;;  %v3276_v40 = vpop.f32.mrb[5].mxu1  ;;  %s3938_s9 = scalar_lea.vmem %s3304_s25, 512  ;;  %p3943_p13 = scmp.lt.s32.totalorder %s3304_s25, %s3304_s25 }
 0x443   :  { %3286 = vst [vmem:[#allocation11 + $0x18] sm:$0xff] %v3276_v40  ;;  %p3939_p12 = scmp.ne.s32.totalorder %s3304_s25, %s3938_s9  ;;  %p3944_p0 = scmp.lt.s32.totalorder %s3938_s9, %s3938_s9 }
 0x445   :  { %p3945_p1 = por %p3944_p0, %p3943_p13 }
 0x447   :  { %p3946_p2 = pnand %p3945_p1, %p3939_p12 }
 0x449   :  { %3949 = shalt.err (!%p3946_p2)
}
 0x44a   :  { %s3950_s2 = scalar_lea.hbm %s5964_s5, 512 }
 0x44b   :  { %p3951_p3 = scmp.ne.s32.totalorder %s5964_s5, %s3950_s2  ;;  %p3954_p4 = scmp.lt.u32.totalorder %s3950_s2, %s5964_s5 }
 0x44d   :  { %p3956_p5 = pnand %p3954_p4, %p3951_p3 }
 0x44f   :  { %3959 = shalt.err (!%p3956_p5)
}
 0x450   :  { %3306 = dma.vmem_to_hbm [thread:$0]  %s3304_s25, 512, %s5964_s5, [#allocation12]  }
 0x451   :  { %3966 = dma.done.wait [#allocation4], 512  }
 0x452   :  { %3967 = vsyncadd [#allocation4], 4294966784 }
 0x453   :  { %3968 = dma.done.wait [#allocation12], 512  }
 0x454   :  { %3969 = vsyncadd [#allocation12], 4294966784 }
 0x455   :  { %3313 = vsyncpa [#allocation3], 1 }
 0x456   :  { %3314 = vsyncpa [#allocation6], 1 }
 0x457   :  { %3315 = vsyncpa [#allocation9], 1 }
 0x458   :  { %3316 = vsyncpa [#allocation4], 1 }
 0x459   :  { %3317 = vsyncpa [#allocation12], 1 }

</bundles_post_ra>
